<compile_context>
chip_gen: v5e
topology: v5e:2x2
jax: 0.10.0
libtpu: 0.0.40
codegen_flags: <defaults>
</compile_context>

<pallas_src>
import math

import jax
import jax.numpy as jnp
import numpy as np
from jax.experimental import pallas as pl
from jax.experimental.pallas import tpu as pltpu

DEPTH = 3           # CausalCNNEncoder(depth=3, ...)
KSIZE = 3           # kernel_size=3
CHANNELS = 40       # channels=40
LEAKY_SLOPE = 0.01  # torch.nn.LeakyReLU default
LANE = 128          # TPU lane width (dense output padding)


def _leaky_relu(x):
    return jnp.where(x > 0, x, LEAKY_SLOPE * x)


# ---------------------------------------------------------------------------
# Kernel-side (batch*time-flattened (M, C) activations, M = bt * t)
# ---------------------------------------------------------------------------

def _causal_conv(x2, w_ref, b_ref, dilation, t, valid):
    """Causal dilated conv1d on batch-flattened activations.

    x2:    (M, Cin) with time contiguous within each batch element.
    w_ref: (K, Cin, Cout) Ref (weights loaded lazily, per tap).
    b_ref: (1, Cout) Ref.
    valid: {shift: (M, 1) bool} precomputed masks, local_time >= shift.

    Tap k looks shift = (K-1-k)*dilation steps into the past: a sublane roll (XLU)
    of the flattened activations, with rows whose local time < shift (which would
    wrap across the batch boundary / before t=0) selected to zero. Each tap is one
    (M, Cin) @ (Cin, Cout) MXU matmul accumulated in f32.
    """
    acc = None
    for k in range(KSIZE):
        shift = (KSIZE - 1 - k) * dilation
        if shift >= t:
            continue                      # tap lies entirely in the zero padding
        if shift == 0:
            xs = x2
        else:
            xs = jnp.where(valid[shift], pltpu.roll(x2, shift, axis=0), 0.0)
        y = jnp.dot(xs, w_ref[k], preferred_element_type=jnp.float32)
        acc = y if acc is None else acc + y
    return acc + b_ref[...]


def _forward_batched(x2, param_refs, bt, t):
    """Full QNetwork forward for one batch tile.

    x2: (bt*t, obs_dim) float32. param_refs: flat list of Refs (consumed in order,
    loaded lazily at point of use). Returns (bt, ACT_PAD) float32 (fc head already
    lane-padded to 128 by prepare_params).
    """
    it = iter(param_refs)
    nxt = lambda: next(it)
    m = bt * t

    # Hoisted once per grid step: per-row local time index and the causal-validity
    # masks for every shift the network uses (reused by all convs / taps).
    tloc = jax.lax.broadcasted_iota(jnp.int32, (bt, t, 1), 1).reshape(m, 1)
    dils = [2 ** i for i in range(DEPTH + 1)]
    shifts = sorted({(KSIZE - 1 - k) * d for d in dils for k in range(KSIZE)} - {0})
    valid = {s: tloc >= s for s in shifts if s < t}

    dilation = 1
    for _ in range(DEPTH + 1):            # CausalCNN: `depth` blocks + final block
        w1, b1, w2, b2 = nxt(), nxt(), nxt(), nxt()
        cin, cout = w1.shape[1], w1.shape[2]
        h = _leaky_relu(_causal_conv(x2, w1, b1, dilation, t, valid))
        h = _leaky_relu(_causal_conv(h, w2, b2, dilation, t, valid))
        if cin != cout:                   # in_channels != out_channels -> 1x1 conv residual
            wres, bres = nxt(), nxt()
            res = jnp.dot(x2, wres[...], preferred_element_type=jnp.float32) + bres[...]
        else:
            res = x2
        x2 = h + res
        dilation *= 2

    # AdaptiveMaxPool1d(1): max over time per batch element -> (bt, hidden)
    v = jnp.max(x2.reshape(bt, t, x2.shape[1]), axis=1)

    wenc, benc = nxt(), nxt()
    e = jnp.dot(v, wenc[...], preferred_element_type=jnp.float32) + benc[...]  # encoder Linear
    e = jnp.maximum(e, 0.0)                                                    # F.relu
    wfc, bfc = nxt(), nxt()                                                    # padded to 128 lanes
    return jnp.dot(e, wfc[...], preferred_element_type=jnp.float32) + bfc[...]  # self.fc_layer


def _make_kernel(bt, t):
    def kernel(x_ref, *refs):
        out_ref = refs[-1]
        param_refs = list(refs[:-1])      # keep Refs; weights are loaded at point of use
        x2 = x_ref[...].astype(jnp.float32)
        out_ref[...] = _forward_batched(x2, param_refs, bt, t)
    return kernel


# ---------------------------------------------------------------------------
# Host-side wrapper
# ---------------------------------------------------------------------------

def prepare_params(params):
    """One-time host-side parameter prep (do NOT call per forward).

    Pads the fc head to a multiple of 128 output lanes so the kernel writes one
    dense (bt, 128k) slab (unmasked vst); everything else is passed through.
    Returns (prepped_param_list, act_dim).
    """
    prepped = list(params)
    wfc, bfc = prepped[-2], prepped[-1]
    act_dim = wfc.shape[1]
    act_pad = -(-act_dim // LANE) * LANE
    prepped[-2] = jnp.pad(wfc, ((0, 0), (0, act_pad - act_dim)))
    prepped[-1] = jnp.pad(bfc, ((0, 0), (0, act_pad - act_dim)))
    return prepped, act_dim


def _param_spec(p):
    nd = p.ndim
    return pl.BlockSpec(p.shape, lambda b, _nd=nd: (0,) * _nd)


def qnetwork_forward(x, prepped_params, act_dim, batch_tile=256):
    """x: (B, T, obs_dim) channels-last float32. Returns (B, act_dim) float32.

    `prepped_params` is the output of prepare_params() (cache it across calls).
    """
    b_sz, t, obs_dim = x.shape
    act_pad = prepped_params[-2].shape[1]

    # Tile selection: big tiles amortize the ~0.35us/grid-step overhead and fill the
    # MXU M dimension; >= 2 balanced tiles when the batch is large enough so the
    # "parallel" grid axis can shard across both TensorCores on v7x.
    if b_sz > batch_tile:
        n_tiles = -(-b_sz // batch_tile)
    elif b_sz >= 64:
        n_tiles = 2
    else:
        n_tiles = 1
    if n_tiles == 1:
        bt = b_sz                          # blocks == full arrays: no alignment needed
    else:
        bt = -(-b_sz // n_tiles)
        bt = -(-bt // 8) * 8               # sublane-align (bt,128) output & (bt*t,.) input blocks
    b_pad = n_tiles * bt

    if b_pad != b_sz:
        x = jnp.pad(x, ((0, b_pad - b_sz), (0, 0), (0, 0)))
    xf = x.reshape(b_pad * t, obs_dim)     # batch*time flattened, time contiguous per sample

    in_specs = [pl.BlockSpec((bt * t, obs_dim), lambda b: (b, 0))]
    in_specs += [_param_spec(p) for p in prepped_params]

    out = pl.pallas_call(
        _make_kernel(bt, t),
        out_shape=jax.ShapeDtypeStruct((b_pad, act_pad), jnp.float32),
        grid_spec=pltpu.PrefetchScalarGridSpec(
            num_scalar_prefetch=0,
            grid=(n_tiles,),
            in_specs=in_specs,
            out_specs=pl.BlockSpec((bt, act_pad), lambda b: (b, 0)),
        ),
        compiler_params=pltpu.CompilerParams(
            dimension_semantics=("parallel",),   # independent batch tiles (2 TCs on v7x)
            vmem_limit_bytes=32 * 1024 * 1024,   # > v5e's 16 MiB scoped default, safe on v7x
        ),
    )(xf, *prepped_params)
    return out[:b_sz, :act_dim]


# ---------------------------------------------------------------------------
# Pure-JAX reference (per-sample, concat-based shifts — independent formulation)
# ---------------------------------------------------------------------------

def _causal_conv_ref(x, w, b, dilation):
    t = x.shape[0]
    acc = jnp.zeros((t, w.shape[2]), jnp.float32)
    for k in range(KSIZE):
        shift = (KSIZE - 1 - k) * dilation
        if shift >= t:
            continue
        if shift == 0:
            xs = x
        else:
            xs = jnp.concatenate(
                [jnp.zeros((shift, x.shape[1]), x.dtype), x[:t - shift, :]], axis=0)
        acc = acc + jnp.dot(xs, w[k], preferred_element_type=jnp.float32)
    return acc + b


def _forward_single_ref(x, params):
    it = iter(params)
    nxt = lambda: next(it)
    dilation = 1
    for _ in range(DEPTH + 1):
        w1, b1, w2, b2 = nxt(), nxt(), nxt(), nxt()
        h = _leaky_relu(_causal_conv_ref(x, w1, b1, dilation))
        h = _leaky_relu(_causal_conv_ref(h, w2, b2, dilation))
        if w1.shape[1] != w1.shape[2]:
            wres, bres = nxt(), nxt()
            res = jnp.dot(x, wres, preferred_element_type=jnp.float32) + bres
        else:
            res = x
        x = h + res
        dilation *= 2
    v = jnp.max(x, axis=0, keepdims=True)
    wenc, benc = nxt(), nxt()
    e = jnp.maximum(jnp.dot(v, wenc, preferred_element_type=jnp.float32) + benc, 0.0)
    wfc, bfc = nxt(), nxt()
    return jnp.dot(e, wfc, preferred_element_type=jnp.float32) + bfc


def qnetwork_ref(x, params):
    return jnp.concatenate(
        [_forward_single_ref(x[b], params) for b in range(x.shape[0])], axis=0)


# ---------------------------------------------------------------------------
# Parameters
# ---------------------------------------------------------------------------

def init_params(key, obs_dim, act_dim, hidden_dim):
    """Deterministic synthetic parameters, flat list in consumption order."""
    keys = iter(jax.random.split(key, 64))

    def dense(shape, fan_in):
        return (jax.random.normal(next(keys), shape, jnp.float32)
                / np.sqrt(float(fan_in))).astype(jnp.float32)

    params = []
    in_c = obs_dim
    for i in range(DEPTH + 1):
        out_c = CHANNELS if i < DEPTH else hidden_dim
        params.append(dense((KSIZE, in_c, out_c), KSIZE * in_c))    # conv1 weight (K, Cin, Cout)
        params.append(dense((1, out_c), KSIZE * in_c))              # conv1 bias
        params.append(dense((KSIZE, out_c, out_c), KSIZE * out_c))  # conv2 weight
        params.append(dense((1, out_c), KSIZE * out_c))             # conv2 bias
        if in_c != out_c:
            params.append(dense((in_c, out_c), in_c))               # residual 1x1 conv
            params.append(dense((1, out_c), in_c))                  # residual bias
        in_c = out_c
    params.append(dense((hidden_dim, hidden_dim), hidden_dim))      # encoder Linear (in, out)
    params.append(dense((1, hidden_dim), hidden_dim))
    params.append(dense((hidden_dim, act_dim), hidden_dim))         # fc_layer (in, out)
    params.append(dense((1, act_dim), hidden_dim))
    return params


if __name__ == "__main__":
    B, T = 2, 16
    obs_dim, act_dim, hidden_dim = 4, 5, 32   # small shapes; hidden_dim is a ctor arg

    key = jax.random.PRNGKey(0)
    kx, kp = jax.random.split(key)
    x = jax.random.normal(kx, (B, T, obs_dim), jnp.float32)  # (B, T, obs_dim) channels-last
    params = init_params(kp, obs_dim, act_dim, hidden_dim)

    prepped, adim = prepare_params(params)    # one-time host prep, reused across calls
    out = qnetwork_forward(x, prepped, adim)
    out = jax.block_until_ready(out)

    ref = qnetwork_ref(x, params)
    np.testing.assert_allclose(np.asarray(out), np.asarray(ref), rtol=1e-4, atol=1e-4)
    print("KERNEL_OK")
</pallas_src>

<mosaic_0001>
module attributes {stable_mosaic.version = 11 : i64} {
  func.func @kernel(%arg0: i32, %arg1: memref<32x4xf32, #tpu.memory_space<vmem>>, %arg2: memref<3x4x40xf32, #tpu.memory_space<vmem>>, %arg3: memref<1x40xf32, #tpu.memory_space<vmem>>, %arg4: memref<3x40x40xf32, #tpu.memory_space<vmem>>, %arg5: memref<1x40xf32, #tpu.memory_space<vmem>>, %arg6: memref<4x40xf32, #tpu.memory_space<vmem>>, %arg7: memref<1x40xf32, #tpu.memory_space<vmem>>, %arg8: memref<3x40x40xf32, #tpu.memory_space<vmem>>, %arg9: memref<1x40xf32, #tpu.memory_space<vmem>>, %arg10: memref<3x40x40xf32, #tpu.memory_space<vmem>>, %arg11: memref<1x40xf32, #tpu.memory_space<vmem>>, %arg12: memref<3x40x40xf32, #tpu.memory_space<vmem>>, %arg13: memref<1x40xf32, #tpu.memory_space<vmem>>, %arg14: memref<3x40x40xf32, #tpu.memory_space<vmem>>, %arg15: memref<1x40xf32, #tpu.memory_space<vmem>>, %arg16: memref<3x40x32xf32, #tpu.memory_space<vmem>>, %arg17: memref<1x32xf32, #tpu.memory_space<vmem>>, %arg18: memref<3x32x32xf32, #tpu.memory_space<vmem>>, %arg19: memref<1x32xf32, #tpu.memory_space<vmem>>, %arg20: memref<40x32xf32, #tpu.memory_space<vmem>>, %arg21: memref<1x32xf32, #tpu.memory_space<vmem>>, %arg22: memref<32x32xf32, #tpu.memory_space<vmem>>, %arg23: memref<1x32xf32, #tpu.memory_space<vmem>>, %arg24: memref<32x128xf32, #tpu.memory_space<vmem>>, %arg25: memref<1x128xf32, #tpu.memory_space<vmem>>, %arg26: memref<2x128xf32, #tpu.memory_space<vmem>>) attributes {dimension_semantics = [#tpu.dimension_semantics<parallel>], iteration_bounds = array<i64: 1>, scalar_prefetch = 0 : i64, scratch_operands = 0 : i64, tpu.core_type = #tpu.core_type<tc>, window_params = [{transform_indices = @transform_0, window_bounds = array<i64: 32, 4>}, {pipeline_mode = #tpu.pipeline_mode<synchronous>, transform_indices = @transform_1, window_bounds = array<i64: 3, 4, 40>}, {pipeline_mode = #tpu.pipeline_mode<synchronous>, transform_indices = @transform_2, window_bounds = array<i64: 1, 40>}, {pipeline_mode = #tpu.pipeline_mode<synchronous>, transform_indices = @transform_3, window_bounds = array<i64: 3, 40, 40>}, {pipeline_mode = #tpu.pipeline_mode<synchronous>, transform_indices = @transform_4, window_bounds = array<i64: 1, 40>}, {pipeline_mode = #tpu.pipeline_mode<synchronous>, transform_indices = @transform_5, window_bounds = array<i64: 4, 40>}, {pipeline_mode = #tpu.pipeline_mode<synchronous>, transform_indices = @transform_6, window_bounds = array<i64: 1, 40>}, {pipeline_mode = #tpu.pipeline_mode<synchronous>, transform_indices = @transform_7, window_bounds = array<i64: 3, 40, 40>}, {pipeline_mode = #tpu.pipeline_mode<synchronous>, transform_indices = @transform_8, window_bounds = array<i64: 1, 40>}, {pipeline_mode = #tpu.pipeline_mode<synchronous>, transform_indices = @transform_9, window_bounds = array<i64: 3, 40, 40>}, {pipeline_mode = #tpu.pipeline_mode<synchronous>, transform_indices = @transform_10, window_bounds = array<i64: 1, 40>}, {pipeline_mode = #tpu.pipeline_mode<synchronous>, transform_indices = @transform_11, window_bounds = array<i64: 3, 40, 40>}, {pipeline_mode = #tpu.pipeline_mode<synchronous>, transform_indices = @transform_12, window_bounds = array<i64: 1, 40>}, {pipeline_mode = #tpu.pipeline_mode<synchronous>, transform_indices = @transform_13, window_bounds = array<i64: 3, 40, 40>}, {pipeline_mode = #tpu.pipeline_mode<synchronous>, transform_indices = @transform_14, window_bounds = array<i64: 1, 40>}, {pipeline_mode = #tpu.pipeline_mode<synchronous>, transform_indices = @transform_15, window_bounds = array<i64: 3, 40, 32>}, {pipeline_mode = #tpu.pipeline_mode<synchronous>, transform_indices = @transform_16, window_bounds = array<i64: 1, 32>}, {pipeline_mode = #tpu.pipeline_mode<synchronous>, transform_indices = @transform_17, window_bounds = array<i64: 3, 32, 32>}, {pipeline_mode = #tpu.pipeline_mode<synchronous>, transform_indices = @transform_18, window_bounds = array<i64: 1, 32>}, {pipeline_mode = #tpu.pipeline_mode<synchronous>, transform_indices = @transform_19, window_bounds = array<i64: 40, 32>}, {pipeline_mode = #tpu.pipeline_mode<synchronous>, transform_indices = @transform_20, window_bounds = array<i64: 1, 32>}, {pipeline_mode = #tpu.pipeline_mode<synchronous>, transform_indices = @transform_21, window_bounds = array<i64: 32, 32>}, {pipeline_mode = #tpu.pipeline_mode<synchronous>, transform_indices = @transform_22, window_bounds = array<i64: 1, 32>}, {pipeline_mode = #tpu.pipeline_mode<synchronous>, transform_indices = @transform_23, window_bounds = array<i64: 32, 128>}, {pipeline_mode = #tpu.pipeline_mode<synchronous>, transform_indices = @transform_24, window_bounds = array<i64: 1, 128>}, {transform_indices = @transform_25, window_bounds = array<i64: 2, 128>}]} {
    %c0 = arith.constant 0 : index
    %c0_0 = arith.constant 0 : index
    %0 = vector.load %arg1[%c0, %c0_0] : memref<32x4xf32, #tpu.memory_space<vmem>>, vector<32x4xf32>
    %1 = tpu.iota {dimensions = array<i32: 1>} : vector<2x16x1xi32>
    %2 = vector.shape_cast %1 : vector<2x16x1xi32> to vector<32x1xi32>
    %c1_i32 = arith.constant 1 : i32
    %3 = vector.broadcast %c1_i32 : i32 to vector<32x1xi32>
    %4 = arith.cmpi sge, %2, %3 : vector<32x1xi32>
    %c2_i32 = arith.constant 2 : i32
    %5 = vector.broadcast %c2_i32 : i32 to vector<32x1xi32>
    %6 = arith.cmpi sge, %2, %5 : vector<32x1xi32>
    %c4_i32 = arith.constant 4 : i32
    %7 = vector.broadcast %c4_i32 : i32 to vector<32x1xi32>
    %8 = arith.cmpi sge, %2, %7 : vector<32x1xi32>
    %c8_i32 = arith.constant 8 : i32
    %9 = vector.broadcast %c8_i32 : i32 to vector<32x1xi32>
    %10 = arith.cmpi sge, %2, %9 : vector<32x1xi32>
    %c2_i32_1 = arith.constant 2 : i32
    %11 = tpu.dynamic_rotate %0 by %c2_i32_1 dim 0 : vector<32x4xf32>, i32 -> vector<32x4xf32>
    %cst = arith.constant 0.000000e+00 : f32
    %12 = vector.shape_cast %6 : vector<32x1xi1> to vector<32x1xi1>
    %13 = vector.broadcast %12 : vector<32x1xi1> to vector<32x4xi1>
    %14 = vector.broadcast %cst : f32 to vector<32x4xf32>
    %15 = arith.select %13, %11, %14 : vector<32x4xi1>, vector<32x4xf32>
    %c0_2 = arith.constant 0 : index
    %c0_3 = arith.constant 0 : index
    %c0_4 = arith.constant 0 : index
    %16 = vector.load %arg2[%c0_2, %c0_3, %c0_4] : memref<3x4x40xf32, #tpu.memory_space<vmem>>, vector<1x4x40xf32>
    %17 = vector.shape_cast %16 : vector<1x4x40xf32> to vector<4x40xf32>
    %cst_5 = arith.constant dense<0.000000e+00> : vector<32x40xf32>
    %18 = tpu.matmul %15, %17, %cst_5 {dimension_numbers = #tpu.dot_dimension_numbers<[1], [0], [0], [1], [0, 0, 1, 1], [], []>} : vector<32x4xf32>, vector<4x40xf32>, vector<32x40xf32> -> vector<32x40xf32>
    %c1_i32_6 = arith.constant 1 : i32
    %19 = tpu.dynamic_rotate %0 by %c1_i32_6 dim 0 : vector<32x4xf32>, i32 -> vector<32x4xf32>
    %cst_7 = arith.constant 0.000000e+00 : f32
    %20 = vector.shape_cast %4 : vector<32x1xi1> to vector<32x1xi1>
    %21 = vector.broadcast %20 : vector<32x1xi1> to vector<32x4xi1>
    %22 = vector.broadcast %cst_7 : f32 to vector<32x4xf32>
    %23 = arith.select %21, %19, %22 : vector<32x4xi1>, vector<32x4xf32>
    %c1 = arith.constant 1 : index
    %c0_8 = arith.constant 0 : index
    %c0_9 = arith.constant 0 : index
    %24 = vector.load %arg2[%c1, %c0_8, %c0_9] : memref<3x4x40xf32, #tpu.memory_space<vmem>>, vector<1x4x40xf32>
    %25 = vector.shape_cast %24 : vector<1x4x40xf32> to vector<4x40xf32>
    %cst_10 = arith.constant dense<0.000000e+00> : vector<32x40xf32>
    %26 = tpu.matmul %23, %25, %cst_10 {dimension_numbers = #tpu.dot_dimension_numbers<[1], [0], [0], [1], [0, 0, 1, 1], [], []>} : vector<32x4xf32>, vector<4x40xf32>, vector<32x40xf32> -> vector<32x40xf32>
    %27 = arith.addf %18, %26 : vector<32x40xf32>
    %c2 = arith.constant 2 : index
    %c0_11 = arith.constant 0 : index
    %c0_12 = arith.constant 0 : index
    %28 = vector.load %arg2[%c2, %c0_11, %c0_12] : memref<3x4x40xf32, #tpu.memory_space<vmem>>, vector<1x4x40xf32>
    %29 = vector.shape_cast %28 : vector<1x4x40xf32> to vector<4x40xf32>
    %cst_13 = arith.constant dense<0.000000e+00> : vector<32x40xf32>
    %30 = tpu.matmul %0, %29, %cst_13 {dimension_numbers = #tpu.dot_dimension_numbers<[1], [0], [0], [1], [0, 0, 1, 1], [], []>} : vector<32x4xf32>, vector<4x40xf32>, vector<32x40xf32> -> vector<32x40xf32>
    %31 = arith.addf %27, %30 : vector<32x40xf32>
    %c0_14 = arith.constant 0 : index
    %c0_15 = arith.constant 0 : index
    %32 = vector.load %arg3[%c0_14, %c0_15] : memref<1x40xf32, #tpu.memory_space<vmem>>, vector<1x40xf32>
    %33 = vector.broadcast %32 : vector<1x40xf32> to vector<32x40xf32>
    %34 = arith.addf %31, %33 : vector<32x40xf32>
    %cst_16 = arith.constant 0.000000e+00 : f32
    %35 = vector.broadcast %cst_16 : f32 to vector<32x40xf32>
    %36 = arith.cmpf ogt, %34, %35 : vector<32x40xf32>
    %cst_17 = arith.constant 0.00999999977 : f32
    %37 = vector.broadcast %cst_17 : f32 to vector<32x40xf32>
    %38 = arith.mulf %37, %34 : vector<32x40xf32>
    %39 = arith.select %36, %34, %38 : vector<32x40xi1>, vector<32x40xf32>
    %c2_i32_18 = arith.constant 2 : i32
    %40 = tpu.dynamic_rotate %39 by %c2_i32_18 dim 0 : vector<32x40xf32>, i32 -> vector<32x40xf32>
    %cst_19 = arith.constant 0.000000e+00 : f32
    %41 = vector.shape_cast %6 : vector<32x1xi1> to vector<32x1xi1>
    %42 = vector.broadcast %41 : vector<32x1xi1> to vector<32x40xi1>
    %43 = vector.broadcast %cst_19 : f32 to vector<32x40xf32>
    %44 = arith.select %42, %40, %43 : vector<32x40xi1>, vector<32x40xf32>
    %c0_20 = arith.constant 0 : index
    %c0_21 = arith.constant 0 : index
    %c0_22 = arith.constant 0 : index
    %45 = vector.load %arg4[%c0_20, %c0_21, %c0_22] : memref<3x40x40xf32, #tpu.memory_space<vmem>>, vector<1x40x40xf32>
    %46 = vector.shape_cast %45 : vector<1x40x40xf32> to vector<40x40xf32>
    %cst_23 = arith.constant dense<0.000000e+00> : vector<32x40xf32>
    %47 = tpu.matmul %44, %46, %cst_23 {dimension_numbers = #tpu.dot_dimension_numbers<[1], [0], [0], [1], [0, 0, 1, 1], [], []>} : vector<32x40xf32>, vector<40x40xf32>, vector<32x40xf32> -> vector<32x40xf32>
    %c1_i32_24 = arith.constant 1 : i32
    %48 = tpu.dynamic_rotate %39 by %c1_i32_24 dim 0 : vector<32x40xf32>, i32 -> vector<32x40xf32>
    %cst_25 = arith.constant 0.000000e+00 : f32
    %49 = vector.shape_cast %4 : vector<32x1xi1> to vector<32x1xi1>
    %50 = vector.broadcast %49 : vector<32x1xi1> to vector<32x40xi1>
    %51 = vector.broadcast %cst_25 : f32 to vector<32x40xf32>
    %52 = arith.select %50, %48, %51 : vector<32x40xi1>, vector<32x40xf32>
    %c1_26 = arith.constant 1 : index
    %c0_27 = arith.constant 0 : index
    %c0_28 = arith.constant 0 : index
    %53 = vector.load %arg4[%c1_26, %c0_27, %c0_28] : memref<3x40x40xf32, #tpu.memory_space<vmem>>, vector<1x40x40xf32>
    %54 = vector.shape_cast %53 : vector<1x40x40xf32> to vector<40x40xf32>
    %cst_29 = arith.constant dense<0.000000e+00> : vector<32x40xf32>
    %55 = tpu.matmul %52, %54, %cst_29 {dimension_numbers = #tpu.dot_dimension_numbers<[1], [0], [0], [1], [0, 0, 1, 1], [], []>} : vector<32x40xf32>, vector<40x40xf32>, vector<32x40xf32> -> vector<32x40xf32>
    %56 = arith.addf %47, %55 : vector<32x40xf32>
    %c2_30 = arith.constant 2 : index
    %c0_31 = arith.constant 0 : index
    %c0_32 = arith.constant 0 : index
    %57 = vector.load %arg4[%c2_30, %c0_31, %c0_32] : memref<3x40x40xf32, #tpu.memory_space<vmem>>, vector<1x40x40xf32>
    %58 = vector.shape_cast %57 : vector<1x40x40xf32> to vector<40x40xf32>
    %cst_33 = arith.constant dense<0.000000e+00> : vector<32x40xf32>
    %59 = tpu.matmul %39, %58, %cst_33 {dimension_numbers = #tpu.dot_dimension_numbers<[1], [0], [0], [1], [0, 0, 1, 1], [], []>} : vector<32x40xf32>, vector<40x40xf32>, vector<32x40xf32> -> vector<32x40xf32>
    %60 = arith.addf %56, %59 : vector<32x40xf32>
    %c0_34 = arith.constant 0 : index
    %c0_35 = arith.constant 0 : index
    %61 = vector.load %arg5[%c0_34, %c0_35] : memref<1x40xf32, #tpu.memory_space<vmem>>, vector<1x40xf32>
    %62 = vector.broadcast %61 : vector<1x40xf32> to vector<32x40xf32>
    %63 = arith.addf %60, %62 : vector<32x40xf32>
    %cst_36 = arith.constant 0.000000e+00 : f32
    %64 = vector.broadcast %cst_36 : f32 to vector<32x40xf32>
    %65 = arith.cmpf ogt, %63, %64 : vector<32x40xf32>
    %cst_37 = arith.constant 0.00999999977 : f32
    %66 = vector.broadcast %cst_37 : f32 to vector<32x40xf32>
    %67 = arith.mulf %66, %63 : vector<32x40xf32>
    %68 = arith.select %65, %63, %67 : vector<32x40xi1>, vector<32x40xf32>
    %c0_38 = arith.constant 0 : index
    %c0_39 = arith.constant 0 : index
    %69 = vector.load %arg6[%c0_38, %c0_39] : memref<4x40xf32, #tpu.memory_space<vmem>>, vector<4x40xf32>
    %cst_40 = arith.constant dense<0.000000e+00> : vector<32x40xf32>
    %70 = tpu.matmul %0, %69, %cst_40 {dimension_numbers = #tpu.dot_dimension_numbers<[1], [0], [0], [1], [0, 0, 1, 1], [], []>} : vector<32x4xf32>, vector<4x40xf32>, vector<32x40xf32> -> vector<32x40xf32>
    %c0_41 = arith.constant 0 : index
    %c0_42 = arith.constant 0 : index
    %71 = vector.load %arg7[%c0_41, %c0_42] : memref<1x40xf32, #tpu.memory_space<vmem>>, vector<1x40xf32>
    %72 = vector.broadcast %71 : vector<1x40xf32> to vector<32x40xf32>
    %73 = arith.addf %70, %72 : vector<32x40xf32>
    %74 = arith.addf %68, %73 : vector<32x40xf32>
    %c4_i32_43 = arith.constant 4 : i32
    %75 = tpu.dynamic_rotate %74 by %c4_i32_43 dim 0 : vector<32x40xf32>, i32 -> vector<32x40xf32>
    %cst_44 = arith.constant 0.000000e+00 : f32
    %76 = vector.shape_cast %8 : vector<32x1xi1> to vector<32x1xi1>
    %77 = vector.broadcast %76 : vector<32x1xi1> to vector<32x40xi1>
    %78 = vector.broadcast %cst_44 : f32 to vector<32x40xf32>
    %79 = arith.select %77, %75, %78 : vector<32x40xi1>, vector<32x40xf32>
    %c0_45 = arith.constant 0 : index
    %c0_46 = arith.constant 0 : index
    %c0_47 = arith.constant 0 : index
    %80 = vector.load %arg8[%c0_45, %c0_46, %c0_47] : memref<3x40x40xf32, #tpu.memory_space<vmem>>, vector<1x40x40xf32>
    %81 = vector.shape_cast %80 : vector<1x40x40xf32> to vector<40x40xf32>
    %cst_48 = arith.constant dense<0.000000e+00> : vector<32x40xf32>
    %82 = tpu.matmul %79, %81, %cst_48 {dimension_numbers = #tpu.dot_dimension_numbers<[1], [0], [0], [1], [0, 0, 1, 1], [], []>} : vector<32x40xf32>, vector<40x40xf32>, vector<32x40xf32> -> vector<32x40xf32>
    %c2_i32_49 = arith.constant 2 : i32
    %83 = tpu.dynamic_rotate %74 by %c2_i32_49 dim 0 : vector<32x40xf32>, i32 -> vector<32x40xf32>
    %cst_50 = arith.constant 0.000000e+00 : f32
    %84 = vector.shape_cast %6 : vector<32x1xi1> to vector<32x1xi1>
    %85 = vector.broadcast %84 : vector<32x1xi1> to vector<32x40xi1>
    %86 = vector.broadcast %cst_50 : f32 to vector<32x40xf32>
    %87 = arith.select %85, %83, %86 : vector<32x40xi1>, vector<32x40xf32>
    %c1_51 = arith.constant 1 : index
    %c0_52 = arith.constant 0 : index
    %c0_53 = arith.constant 0 : index
    %88 = vector.load %arg8[%c1_51, %c0_52, %c0_53] : memref<3x40x40xf32, #tpu.memory_space<vmem>>, vector<1x40x40xf32>
    %89 = vector.shape_cast %88 : vector<1x40x40xf32> to vector<40x40xf32>
    %cst_54 = arith.constant dense<0.000000e+00> : vector<32x40xf32>
    %90 = tpu.matmul %87, %89, %cst_54 {dimension_numbers = #tpu.dot_dimension_numbers<[1], [0], [0], [1], [0, 0, 1, 1], [], []>} : vector<32x40xf32>, vector<40x40xf32>, vector<32x40xf32> -> vector<32x40xf32>
    %91 = arith.addf %82, %90 : vector<32x40xf32>
    %c2_55 = arith.constant 2 : index
    %c0_56 = arith.constant 0 : index
    %c0_57 = arith.constant 0 : index
    %92 = vector.load %arg8[%c2_55, %c0_56, %c0_57] : memref<3x40x40xf32, #tpu.memory_space<vmem>>, vector<1x40x40xf32>
    %93 = vector.shape_cast %92 : vector<1x40x40xf32> to vector<40x40xf32>
    %cst_58 = arith.constant dense<0.000000e+00> : vector<32x40xf32>
    %94 = tpu.matmul %74, %93, %cst_58 {dimension_numbers = #tpu.dot_dimension_numbers<[1], [0], [0], [1], [0, 0, 1, 1], [], []>} : vector<32x40xf32>, vector<40x40xf32>, vector<32x40xf32> -> vector<32x40xf32>
    %95 = arith.addf %91, %94 : vector<32x40xf32>
    %c0_59 = arith.constant 0 : index
    %c0_60 = arith.constant 0 : index
    %96 = vector.load %arg9[%c0_59, %c0_60] : memref<1x40xf32, #tpu.memory_space<vmem>>, vector<1x40xf32>
    %97 = vector.broadcast %96 : vector<1x40xf32> to vector<32x40xf32>
    %98 = arith.addf %95, %97 : vector<32x40xf32>
    %cst_61 = arith.constant 0.000000e+00 : f32
    %99 = vector.broadcast %cst_61 : f32 to vector<32x40xf32>
    %100 = arith.cmpf ogt, %98, %99 : vector<32x40xf32>
    %cst_62 = arith.constant 0.00999999977 : f32
    %101 = vector.broadcast %cst_62 : f32 to vector<32x40xf32>
    %102 = arith.mulf %101, %98 : vector<32x40xf32>
    %103 = arith.select %100, %98, %102 : vector<32x40xi1>, vector<32x40xf32>
    %c4_i32_63 = arith.constant 4 : i32
    %104 = tpu.dynamic_rotate %103 by %c4_i32_63 dim 0 : vector<32x40xf32>, i32 -> vector<32x40xf32>
    %cst_64 = arith.constant 0.000000e+00 : f32
    %105 = vector.shape_cast %8 : vector<32x1xi1> to vector<32x1xi1>
    %106 = vector.broadcast %105 : vector<32x1xi1> to vector<32x40xi1>
    %107 = vector.broadcast %cst_64 : f32 to vector<32x40xf32>
    %108 = arith.select %106, %104, %107 : vector<32x40xi1>, vector<32x40xf32>
    %c0_65 = arith.constant 0 : index
    %c0_66 = arith.constant 0 : index
    %c0_67 = arith.constant 0 : index
    %109 = vector.load %arg10[%c0_65, %c0_66, %c0_67] : memref<3x40x40xf32, #tpu.memory_space<vmem>>, vector<1x40x40xf32>
    %110 = vector.shape_cast %109 : vector<1x40x40xf32> to vector<40x40xf32>
    %cst_68 = arith.constant dense<0.000000e+00> : vector<32x40xf32>
    %111 = tpu.matmul %108, %110, %cst_68 {dimension_numbers = #tpu.dot_dimension_numbers<[1], [0], [0], [1], [0, 0, 1, 1], [], []>} : vector<32x40xf32>, vector<40x40xf32>, vector<32x40xf32> -> vector<32x40xf32>
    %c2_i32_69 = arith.constant 2 : i32
    %112 = tpu.dynamic_rotate %103 by %c2_i32_69 dim 0 : vector<32x40xf32>, i32 -> vector<32x40xf32>
    %cst_70 = arith.constant 0.000000e+00 : f32
    %113 = vector.shape_cast %6 : vector<32x1xi1> to vector<32x1xi1>
    %114 = vector.broadcast %113 : vector<32x1xi1> to vector<32x40xi1>
    %115 = vector.broadcast %cst_70 : f32 to vector<32x40xf32>
    %116 = arith.select %114, %112, %115 : vector<32x40xi1>, vector<32x40xf32>
    %c1_71 = arith.constant 1 : index
    %c0_72 = arith.constant 0 : index
    %c0_73 = arith.constant 0 : index
    %117 = vector.load %arg10[%c1_71, %c0_72, %c0_73] : memref<3x40x40xf32, #tpu.memory_space<vmem>>, vector<1x40x40xf32>
    %118 = vector.shape_cast %117 : vector<1x40x40xf32> to vector<40x40xf32>
    %cst_74 = arith.constant dense<0.000000e+00> : vector<32x40xf32>
    %119 = tpu.matmul %116, %118, %cst_74 {dimension_numbers = #tpu.dot_dimension_numbers<[1], [0], [0], [1], [0, 0, 1, 1], [], []>} : vector<32x40xf32>, vector<40x40xf32>, vector<32x40xf32> -> vector<32x40xf32>
    %120 = arith.addf %111, %119 : vector<32x40xf32>
    %c2_75 = arith.constant 2 : index
    %c0_76 = arith.constant 0 : index
    %c0_77 = arith.constant 0 : index
    %121 = vector.load %arg10[%c2_75, %c0_76, %c0_77] : memref<3x40x40xf32, #tpu.memory_space<vmem>>, vector<1x40x40xf32>
    %122 = vector.shape_cast %121 : vector<1x40x40xf32> to vector<40x40xf32>
    %cst_78 = arith.constant dense<0.000000e+00> : vector<32x40xf32>
    %123 = tpu.matmul %103, %122, %cst_78 {dimension_numbers = #tpu.dot_dimension_numbers<[1], [0], [0], [1], [0, 0, 1, 1], [], []>} : vector<32x40xf32>, vector<40x40xf32>, vector<32x40xf32> -> vector<32x40xf32>
    %124 = arith.addf %120, %123 : vector<32x40xf32>
    %c0_79 = arith.constant 0 : index
    %c0_80 = arith.constant 0 : index
    %125 = vector.load %arg11[%c0_79, %c0_80] : memref<1x40xf32, #tpu.memory_space<vmem>>, vector<1x40xf32>
    %126 = vector.broadcast %125 : vector<1x40xf32> to vector<32x40xf32>
    %127 = arith.addf %124, %126 : vector<32x40xf32>
    %cst_81 = arith.constant 0.000000e+00 : f32
    %128 = vector.broadcast %cst_81 : f32 to vector<32x40xf32>
    %129 = arith.cmpf ogt, %127, %128 : vector<32x40xf32>
    %cst_82 = arith.constant 0.00999999977 : f32
    %130 = vector.broadcast %cst_82 : f32 to vector<32x40xf32>
    %131 = arith.mulf %130, %127 : vector<32x40xf32>
    %132 = arith.select %129, %127, %131 : vector<32x40xi1>, vector<32x40xf32>
    %133 = arith.addf %132, %74 : vector<32x40xf32>
    %c8_i32_83 = arith.constant 8 : i32
    %134 = tpu.dynamic_rotate %133 by %c8_i32_83 dim 0 : vector<32x40xf32>, i32 -> vector<32x40xf32>
    %cst_84 = arith.constant 0.000000e+00 : f32
    %135 = vector.shape_cast %10 : vector<32x1xi1> to vector<32x1xi1>
    %136 = vector.broadcast %135 : vector<32x1xi1> to vector<32x40xi1>
    %137 = vector.broadcast %cst_84 : f32 to vector<32x40xf32>
    %138 = arith.select %136, %134, %137 : vector<32x40xi1>, vector<32x40xf32>
    %c0_85 = arith.constant 0 : index
    %c0_86 = arith.constant 0 : index
    %c0_87 = arith.constant 0 : index
    %139 = vector.load %arg12[%c0_85, %c0_86, %c0_87] : memref<3x40x40xf32, #tpu.memory_space<vmem>>, vector<1x40x40xf32>
    %140 = vector.shape_cast %139 : vector<1x40x40xf32> to vector<40x40xf32>
    %cst_88 = arith.constant dense<0.000000e+00> : vector<32x40xf32>
    %141 = tpu.matmul %138, %140, %cst_88 {dimension_numbers = #tpu.dot_dimension_numbers<[1], [0], [0], [1], [0, 0, 1, 1], [], []>} : vector<32x40xf32>, vector<40x40xf32>, vector<32x40xf32> -> vector<32x40xf32>
    %c4_i32_89 = arith.constant 4 : i32
    %142 = tpu.dynamic_rotate %133 by %c4_i32_89 dim 0 : vector<32x40xf32>, i32 -> vector<32x40xf32>
    %cst_90 = arith.constant 0.000000e+00 : f32
    %143 = vector.shape_cast %8 : vector<32x1xi1> to vector<32x1xi1>
    %144 = vector.broadcast %143 : vector<32x1xi1> to vector<32x40xi1>
    %145 = vector.broadcast %cst_90 : f32 to vector<32x40xf32>
    %146 = arith.select %144, %142, %145 : vector<32x40xi1>, vector<32x40xf32>
    %c1_91 = arith.constant 1 : index
    %c0_92 = arith.constant 0 : index
    %c0_93 = arith.constant 0 : index
    %147 = vector.load %arg12[%c1_91, %c0_92, %c0_93] : memref<3x40x40xf32, #tpu.memory_space<vmem>>, vector<1x40x40xf32>
    %148 = vector.shape_cast %147 : vector<1x40x40xf32> to vector<40x40xf32>
    %cst_94 = arith.constant dense<0.000000e+00> : vector<32x40xf32>
    %149 = tpu.matmul %146, %148, %cst_94 {dimension_numbers = #tpu.dot_dimension_numbers<[1], [0], [0], [1], [0, 0, 1, 1], [], []>} : vector<32x40xf32>, vector<40x40xf32>, vector<32x40xf32> -> vector<32x40xf32>
    %150 = arith.addf %141, %149 : vector<32x40xf32>
    %c2_95 = arith.constant 2 : index
    %c0_96 = arith.constant 0 : index
    %c0_97 = arith.constant 0 : index
    %151 = vector.load %arg12[%c2_95, %c0_96, %c0_97] : memref<3x40x40xf32, #tpu.memory_space<vmem>>, vector<1x40x40xf32>
    %152 = vector.shape_cast %151 : vector<1x40x40xf32> to vector<40x40xf32>
    %cst_98 = arith.constant dense<0.000000e+00> : vector<32x40xf32>
    %153 = tpu.matmul %133, %152, %cst_98 {dimension_numbers = #tpu.dot_dimension_numbers<[1], [0], [0], [1], [0, 0, 1, 1], [], []>} : vector<32x40xf32>, vector<40x40xf32>, vector<32x40xf32> -> vector<32x40xf32>
    %154 = arith.addf %150, %153 : vector<32x40xf32>
    %c0_99 = arith.constant 0 : index
    %c0_100 = arith.constant 0 : index
    %155 = vector.load %arg13[%c0_99, %c0_100] : memref<1x40xf32, #tpu.memory_space<vmem>>, vector<1x40xf32>
    %156 = vector.broadcast %155 : vector<1x40xf32> to vector<32x40xf32>
    %157 = arith.addf %154, %156 : vector<32x40xf32>
    %cst_101 = arith.constant 0.000000e+00 : f32
    %158 = vector.broadcast %cst_101 : f32 to vector<32x40xf32>
    %159 = arith.cmpf ogt, %157, %158 : vector<32x40xf32>
    %cst_102 = arith.constant 0.00999999977 : f32
    %160 = vector.broadcast %cst_102 : f32 to vector<32x40xf32>
    %161 = arith.mulf %160, %157 : vector<32x40xf32>
    %162 = arith.select %159, %157, %161 : vector<32x40xi1>, vector<32x40xf32>
    %c8_i32_103 = arith.constant 8 : i32
    %163 = tpu.dynamic_rotate %162 by %c8_i32_103 dim 0 : vector<32x40xf32>, i32 -> vector<32x40xf32>
    %cst_104 = arith.constant 0.000000e+00 : f32
    %164 = vector.shape_cast %10 : vector<32x1xi1> to vector<32x1xi1>
    %165 = vector.broadcast %164 : vector<32x1xi1> to vector<32x40xi1>
    %166 = vector.broadcast %cst_104 : f32 to vector<32x40xf32>
    %167 = arith.select %165, %163, %166 : vector<32x40xi1>, vector<32x40xf32>
    %c0_105 = arith.constant 0 : index
    %c0_106 = arith.constant 0 : index
    %c0_107 = arith.constant 0 : index
    %168 = vector.load %arg14[%c0_105, %c0_106, %c0_107] : memref<3x40x40xf32, #tpu.memory_space<vmem>>, vector<1x40x40xf32>
    %169 = vector.shape_cast %168 : vector<1x40x40xf32> to vector<40x40xf32>
    %cst_108 = arith.constant dense<0.000000e+00> : vector<32x40xf32>
    %170 = tpu.matmul %167, %169, %cst_108 {dimension_numbers = #tpu.dot_dimension_numbers<[1], [0], [0], [1], [0, 0, 1, 1], [], []>} : vector<32x40xf32>, vector<40x40xf32>, vector<32x40xf32> -> vector<32x40xf32>
    %c4_i32_109 = arith.constant 4 : i32
    %171 = tpu.dynamic_rotate %162 by %c4_i32_109 dim 0 : vector<32x40xf32>, i32 -> vector<32x40xf32>
    %cst_110 = arith.constant 0.000000e+00 : f32
    %172 = vector.shape_cast %8 : vector<32x1xi1> to vector<32x1xi1>
    %173 = vector.broadcast %172 : vector<32x1xi1> to vector<32x40xi1>
    %174 = vector.broadcast %cst_110 : f32 to vector<32x40xf32>
    %175 = arith.select %173, %171, %174 : vector<32x40xi1>, vector<32x40xf32>
    %c1_111 = arith.constant 1 : index
    %c0_112 = arith.constant 0 : index
    %c0_113 = arith.constant 0 : index
    %176 = vector.load %arg14[%c1_111, %c0_112, %c0_113] : memref<3x40x40xf32, #tpu.memory_space<vmem>>, vector<1x40x40xf32>
    %177 = vector.shape_cast %176 : vector<1x40x40xf32> to vector<40x40xf32>
    %cst_114 = arith.constant dense<0.000000e+00> : vector<32x40xf32>
    %178 = tpu.matmul %175, %177, %cst_114 {dimension_numbers = #tpu.dot_dimension_numbers<[1], [0], [0], [1], [0, 0, 1, 1], [], []>} : vector<32x40xf32>, vector<40x40xf32>, vector<32x40xf32> -> vector<32x40xf32>
    %179 = arith.addf %170, %178 : vector<32x40xf32>
    %c2_115 = arith.constant 2 : index
    %c0_116 = arith.constant 0 : index
    %c0_117 = arith.constant 0 : index
    %180 = vector.load %arg14[%c2_115, %c0_116, %c0_117] : memref<3x40x40xf32, #tpu.memory_space<vmem>>, vector<1x40x40xf32>
    %181 = vector.shape_cast %180 : vector<1x40x40xf32> to vector<40x40xf32>
    %cst_118 = arith.constant dense<0.000000e+00> : vector<32x40xf32>
    %182 = tpu.matmul %162, %181, %cst_118 {dimension_numbers = #tpu.dot_dimension_numbers<[1], [0], [0], [1], [0, 0, 1, 1], [], []>} : vector<32x40xf32>, vector<40x40xf32>, vector<32x40xf32> -> vector<32x40xf32>
    %183 = arith.addf %179, %182 : vector<32x40xf32>
    %c0_119 = arith.constant 0 : index
    %c0_120 = arith.constant 0 : index
    %184 = vector.load %arg15[%c0_119, %c0_120] : memref<1x40xf32, #tpu.memory_space<vmem>>, vector<1x40xf32>
    %185 = vector.broadcast %184 : vector<1x40xf32> to vector<32x40xf32>
    %186 = arith.addf %183, %185 : vector<32x40xf32>
    %cst_121 = arith.constant 0.000000e+00 : f32
    %187 = vector.broadcast %cst_121 : f32 to vector<32x40xf32>
    %188 = arith.cmpf ogt, %186, %187 : vector<32x40xf32>
    %cst_122 = arith.constant 0.00999999977 : f32
    %189 = vector.broadcast %cst_122 : f32 to vector<32x40xf32>
    %190 = arith.mulf %189, %186 : vector<32x40xf32>
    %191 = arith.select %188, %186, %190 : vector<32x40xi1>, vector<32x40xf32>
    %192 = arith.addf %191, %133 : vector<32x40xf32>
    %c8_i32_123 = arith.constant 8 : i32
    %193 = tpu.dynamic_rotate %192 by %c8_i32_123 dim 0 : vector<32x40xf32>, i32 -> vector<32x40xf32>
    %cst_124 = arith.constant 0.000000e+00 : f32
    %194 = vector.shape_cast %10 : vector<32x1xi1> to vector<32x1xi1>
    %195 = vector.broadcast %194 : vector<32x1xi1> to vector<32x40xi1>
    %196 = vector.broadcast %cst_124 : f32 to vector<32x40xf32>
    %197 = arith.select %195, %193, %196 : vector<32x40xi1>, vector<32x40xf32>
    %c1_125 = arith.constant 1 : index
    %c0_126 = arith.constant 0 : index
    %c0_127 = arith.constant 0 : index
    %198 = vector.load %arg16[%c1_125, %c0_126, %c0_127] : memref<3x40x32xf32, #tpu.memory_space<vmem>>, vector<1x40x32xf32>
    %199 = vector.shape_cast %198 : vector<1x40x32xf32> to vector<40x32xf32>
    %cst_128 = arith.constant dense<0.000000e+00> : vector<32x32xf32>
    %200 = tpu.matmul %197, %199, %cst_128 {dimension_numbers = #tpu.dot_dimension_numbers<[1], [0], [0], [1], [0, 0, 1, 1], [], []>} : vector<32x40xf32>, vector<40x32xf32>, vector<32x32xf32> -> vector<32x32xf32>
    %c2_129 = arith.constant 2 : index
    %c0_130 = arith.constant 0 : index
    %c0_131 = arith.constant 0 : index
    %201 = vector.load %arg16[%c2_129, %c0_130, %c0_131] : memref<3x40x32xf32, #tpu.memory_space<vmem>>, vector<1x40x32xf32>
    %202 = vector.shape_cast %201 : vector<1x40x32xf32> to vector<40x32xf32>
    %cst_132 = arith.constant dense<0.000000e+00> : vector<32x32xf32>
    %203 = tpu.matmul %192, %202, %cst_132 {dimension_numbers = #tpu.dot_dimension_numbers<[1], [0], [0], [1], [0, 0, 1, 1], [], []>} : vector<32x40xf32>, vector<40x32xf32>, vector<32x32xf32> -> vector<32x32xf32>
    %204 = arith.addf %200, %203 : vector<32x32xf32>
    %c0_133 = arith.constant 0 : index
    %c0_134 = arith.constant 0 : index
    %205 = vector.load %arg17[%c0_133, %c0_134] : memref<1x32xf32, #tpu.memory_space<vmem>>, vector<1x32xf32>
    %206 = vector.broadcast %205 : vector<1x32xf32> to vector<32x32xf32>
    %207 = arith.addf %204, %206 : vector<32x32xf32>
    %cst_135 = arith.constant 0.000000e+00 : f32
    %208 = vector.broadcast %cst_135 : f32 to vector<32x32xf32>
    %209 = arith.cmpf ogt, %207, %208 : vector<32x32xf32>
    %cst_136 = arith.constant 0.00999999977 : f32
    %210 = vector.broadcast %cst_136 : f32 to vector<32x32xf32>
    %211 = arith.mulf %210, %207 : vector<32x32xf32>
    %212 = arith.select %209, %207, %211 : vector<32x32xi1>, vector<32x32xf32>
    %c8_i32_137 = arith.constant 8 : i32
    %213 = tpu.dynamic_rotate %212 by %c8_i32_137 dim 0 : vector<32x32xf32>, i32 -> vector<32x32xf32>
    %cst_138 = arith.constant 0.000000e+00 : f32
    %214 = vector.shape_cast %10 : vector<32x1xi1> to vector<32x1xi1>
    %215 = vector.broadcast %214 : vector<32x1xi1> to vector<32x32xi1>
    %216 = vector.broadcast %cst_138 : f32 to vector<32x32xf32>
    %217 = arith.select %215, %213, %216 : vector<32x32xi1>, vector<32x32xf32>
    %c1_139 = arith.constant 1 : index
    %c0_140 = arith.constant 0 : index
    %c0_141 = arith.constant 0 : index
    %218 = vector.load %arg18[%c1_139, %c0_140, %c0_141] : memref<3x32x32xf32, #tpu.memory_space<vmem>>, vector<1x32x32xf32>
    %219 = vector.shape_cast %218 : vector<1x32x32xf32> to vector<32x32xf32>
    %cst_142 = arith.constant dense<0.000000e+00> : vector<32x32xf32>
    %220 = tpu.matmul %217, %219, %cst_142 {dimension_numbers = #tpu.dot_dimension_numbers<[1], [0], [0], [1], [0, 0, 1, 1], [], []>} : vector<32x32xf32>, vector<32x32xf32>, vector<32x32xf32> -> vector<32x32xf32>
    %c2_143 = arith.constant 2 : index
    %c0_144 = arith.constant 0 : index
    %c0_145 = arith.constant 0 : index
    %221 = vector.load %arg18[%c2_143, %c0_144, %c0_145] : memref<3x32x32xf32, #tpu.memory_space<vmem>>, vector<1x32x32xf32>
    %222 = vector.shape_cast %221 : vector<1x32x32xf32> to vector<32x32xf32>
    %cst_146 = arith.constant dense<0.000000e+00> : vector<32x32xf32>
    %223 = tpu.matmul %212, %222, %cst_146 {dimension_numbers = #tpu.dot_dimension_numbers<[1], [0], [0], [1], [0, 0, 1, 1], [], []>} : vector<32x32xf32>, vector<32x32xf32>, vector<32x32xf32> -> vector<32x32xf32>
    %224 = arith.addf %220, %223 : vector<32x32xf32>
    %c0_147 = arith.constant 0 : index
    %c0_148 = arith.constant 0 : index
    %225 = vector.load %arg19[%c0_147, %c0_148] : memref<1x32xf32, #tpu.memory_space<vmem>>, vector<1x32xf32>
    %226 = vector.broadcast %225 : vector<1x32xf32> to vector<32x32xf32>
    %227 = arith.addf %224, %226 : vector<32x32xf32>
    %cst_149 = arith.constant 0.000000e+00 : f32
    %228 = vector.broadcast %cst_149 : f32 to vector<32x32xf32>
    %229 = arith.cmpf ogt, %227, %228 : vector<32x32xf32>
    %cst_150 = arith.constant 0.00999999977 : f32
    %230 = vector.broadcast %cst_150 : f32 to vector<32x32xf32>
    %231 = arith.mulf %230, %227 : vector<32x32xf32>
    %232 = arith.select %229, %227, %231 : vector<32x32xi1>, vector<32x32xf32>
    %c0_151 = arith.constant 0 : index
    %c0_152 = arith.constant 0 : index
    %233 = vector.load %arg20[%c0_151, %c0_152] : memref<40x32xf32, #tpu.memory_space<vmem>>, vector<40x32xf32>
    %cst_153 = arith.constant dense<0.000000e+00> : vector<32x32xf32>
    %234 = tpu.matmul %192, %233, %cst_153 {dimension_numbers = #tpu.dot_dimension_numbers<[1], [0], [0], [1], [0, 0, 1, 1], [], []>} : vector<32x40xf32>, vector<40x32xf32>, vector<32x32xf32> -> vector<32x32xf32>
    %c0_154 = arith.constant 0 : index
    %c0_155 = arith.constant 0 : index
    %235 = vector.load %arg21[%c0_154, %c0_155] : memref<1x32xf32, #tpu.memory_space<vmem>>, vector<1x32xf32>
    %236 = vector.broadcast %235 : vector<1x32xf32> to vector<32x32xf32>
    %237 = arith.addf %234, %236 : vector<32x32xf32>
    %238 = arith.addf %232, %237 : vector<32x32xf32>
    %239 = vector.shape_cast %238 : vector<32x32xf32> to vector<2x16x32xf32>
    %cst_156 = arith.constant dense<0xFF800000> : vector<2x32xf32>
    %240 = vector.multi_reduction <maximumf>, %239, %cst_156 [1] : vector<2x16x32xf32> to vector<2x32xf32>
    %c0_157 = arith.constant 0 : index
    %c0_158 = arith.constant 0 : index
    %241 = vector.load %arg22[%c0_157, %c0_158] : memref<32x32xf32, #tpu.memory_space<vmem>>, vector<32x32xf32>
    %cst_159 = arith.constant dense<0.000000e+00> : vector<2x32xf32>
    %242 = tpu.matmul %240, %241, %cst_159 {dimension_numbers = #tpu.dot_dimension_numbers<[1], [0], [0], [1], [0, 0, 1, 1], [], []>} : vector<2x32xf32>, vector<32x32xf32>, vector<2x32xf32> -> vector<2x32xf32>
    %c0_160 = arith.constant 0 : index
    %c0_161 = arith.constant 0 : index
    %243 = vector.load %arg23[%c0_160, %c0_161] : memref<1x32xf32, #tpu.memory_space<vmem>>, vector<1x32xf32>
    %244 = vector.broadcast %243 : vector<1x32xf32> to vector<2x32xf32>
    %245 = arith.addf %242, %244 : vector<2x32xf32>
    %cst_162 = arith.constant 0.000000e+00 : f32
    %246 = vector.broadcast %cst_162 : f32 to vector<2x32xf32>
    %247 = arith.maximumf %245, %246 : vector<2x32xf32>
    %c0_163 = arith.constant 0 : index
    %c0_164 = arith.constant 0 : index
    %248 = vector.load %arg24[%c0_163, %c0_164] : memref<32x128xf32, #tpu.memory_space<vmem>>, vector<32x128xf32>
    %cst_165 = arith.constant dense<0.000000e+00> : vector<2x128xf32>
    %249 = tpu.matmul %247, %248, %cst_165 {dimension_numbers = #tpu.dot_dimension_numbers<[1], [0], [0], [1], [0, 0, 1, 1], [], []>} : vector<2x32xf32>, vector<32x128xf32>, vector<2x128xf32> -> vector<2x128xf32>
    %c0_166 = arith.constant 0 : index
    %c0_167 = arith.constant 0 : index
    %250 = vector.load %arg25[%c0_166, %c0_167] : memref<1x128xf32, #tpu.memory_space<vmem>>, vector<1x128xf32>
    %251 = vector.broadcast %250 : vector<1x128xf32> to vector<2x128xf32>
    %252 = arith.addf %249, %251 : vector<2x128xf32>
    %c0_168 = arith.constant 0 : index
    %c0_169 = arith.constant 0 : index
    %253 = vector.load %arg26[%c0_168, %c0_169] : memref<2x128xf32, #tpu.memory_space<vmem>>, vector<2x128xf32>
    tpu.vector_store %arg26[%c0_168, %c0_169], %252 {strides = array<i32>} : memref<2x128xf32, #tpu.memory_space<vmem>>, vector<2x128xf32>,
    return
  }
  func.func @transform_0(%arg0: i32) -> (i32, i32) {
    %c0_i32 = arith.constant 0 : i32
    %c0_i32_0 = arith.constant 0 : i32
    return %arg0, %c0_i32 : i32, i32
  }
  func.func @transform_1(%arg0: i32) -> (i32, i32, i32) {
    %c0_i32 = arith.constant 0 : i32
    %c0_i32_0 = arith.constant 0 : i32
    %c0_i32_1 = arith.constant 0 : i32
    %c0_i32_2 = arith.constant 0 : i32
    return %c0_i32, %c0_i32_0, %c0_i32_1 : i32, i32, i32
  }
  func.func @transform_2(%arg0: i32) -> (i32, i32) {
    %c0_i32 = arith.constant 0 : i32
    %c0_i32_0 = arith.constant 0 : i32
    %c0_i32_1 = arith.constant 0 : i32
    return %c0_i32, %c0_i32_0 : i32, i32
  }
  func.func @transform_3(%arg0: i32) -> (i32, i32, i32) {
    %c0_i32 = arith.constant 0 : i32
    %c0_i32_0 = arith.constant 0 : i32
    %c0_i32_1 = arith.constant 0 : i32
    %c0_i32_2 = arith.constant 0 : i32
    return %c0_i32, %c0_i32_0, %c0_i32_1 : i32, i32, i32
  }
  func.func @transform_4(%arg0: i32) -> (i32, i32) {
    %c0_i32 = arith.constant 0 : i32
    %c0_i32_0 = arith.constant 0 : i32
    %c0_i32_1 = arith.constant 0 : i32
    return %c0_i32, %c0_i32_0 : i32, i32
  }
  func.func @transform_5(%arg0: i32) -> (i32, i32) {
    %c0_i32 = arith.constant 0 : i32
    %c0_i32_0 = arith.constant 0 : i32
    %c0_i32_1 = arith.constant 0 : i32
    return %c0_i32, %c0_i32_0 : i32, i32
  }
  func.func @transform_6(%arg0: i32) -> (i32, i32) {
    %c0_i32 = arith.constant 0 : i32
    %c0_i32_0 = arith.constant 0 : i32
    %c0_i32_1 = arith.constant 0 : i32
    return %c0_i32, %c0_i32_0 : i32, i32
  }
  func.func @transform_7(%arg0: i32) -> (i32, i32, i32) {
    %c0_i32 = arith.constant 0 : i32
    %c0_i32_0 = arith.constant 0 : i32
    %c0_i32_1 = arith.constant 0 : i32
    %c0_i32_2 = arith.constant 0 : i32
    return %c0_i32, %c0_i32_0, %c0_i32_1 : i32, i32, i32
  }
  func.func @transform_8(%arg0: i32) -> (i32, i32) {
    %c0_i32 = arith.constant 0 : i32
    %c0_i32_0 = arith.constant 0 : i32
    %c0_i32_1 = arith.constant 0 : i32
    return %c0_i32, %c0_i32_0 : i32, i32
  }
  func.func @transform_9(%arg0: i32) -> (i32, i32, i32) {
    %c0_i32 = arith.constant 0 : i32
    %c0_i32_0 = arith.constant 0 : i32
    %c0_i32_1 = arith.constant 0 : i32
    %c0_i32_2 = arith.constant 0 : i32
    return %c0_i32, %c0_i32_0, %c0_i32_1 : i32, i32, i32
  }
  func.func @transform_10(%arg0: i32) -> (i32, i32) {
    %c0_i32 = arith.constant 0 : i32
    %c0_i32_0 = arith.constant 0 : i32
    %c0_i32_1 = arith.constant 0 : i32
    return %c0_i32, %c0_i32_0 : i32, i32
  }
  func.func @transform_11(%arg0: i32) -> (i32, i32, i32) {
    %c0_i32 = arith.constant 0 : i32
    %c0_i32_0 = arith.constant 0 : i32
    %c0_i32_1 = arith.constant 0 : i32
    %c0_i32_2 = arith.constant 0 : i32
    return %c0_i32, %c0_i32_0, %c0_i32_1 : i32, i32, i32
  }
  func.func @transform_12(%arg0: i32) -> (i32, i32) {
    %c0_i32 = arith.constant 0 : i32
    %c0_i32_0 = arith.constant 0 : i32
    %c0_i32_1 = arith.constant 0 : i32
    return %c0_i32, %c0_i32_0 : i32, i32
  }
  func.func @transform_13(%arg0: i32) -> (i32, i32, i32) {
    %c0_i32 = arith.constant 0 : i32
    %c0_i32_0 = arith.constant 0 : i32
    %c0_i32_1 = arith.constant 0 : i32
    %c0_i32_2 = arith.constant 0 : i32
    return %c0_i32, %c0_i32_0, %c0_i32_1 : i32, i32, i32
  }
  func.func @transform_14(%arg0: i32) -> (i32, i32) {
    %c0_i32 = arith.constant 0 : i32
    %c0_i32_0 = arith.constant 0 : i32
    %c0_i32_1 = arith.constant 0 : i32
    return %c0_i32, %c0_i32_0 : i32, i32
  }
  func.func @transform_15(%arg0: i32) -> (i32, i32, i32) {
    %c0_i32 = arith.constant 0 : i32
    %c0_i32_0 = arith.constant 0 : i32
    %c0_i32_1 = arith.constant 0 : i32
    %c0_i32_2 = arith.constant 0 : i32
    return %c0_i32, %c0_i32_0, %c0_i32_1 : i32, i32, i32
  }
  func.func @transform_16(%arg0: i32) -> (i32, i32) {
    %c0_i32 = arith.constant 0 : i32
    %c0_i32_0 = arith.constant 0 : i32
    %c0_i32_1 = arith.constant 0 : i32
    return %c0_i32, %c0_i32_0 : i32, i32
  }
  func.func @transform_17(%arg0: i32) -> (i32, i32, i32) {
    %c0_i32 = arith.constant 0 : i32
    %c0_i32_0 = arith.constant 0 : i32
    %c0_i32_1 = arith.constant 0 : i32
    %c0_i32_2 = arith.constant 0 : i32
    return %c0_i32, %c0_i32_0, %c0_i32_1 : i32, i32, i32
  }
  func.func @transform_18(%arg0: i32) -> (i32, i32) {
    %c0_i32 = arith.constant 0 : i32
    %c0_i32_0 = arith.constant 0 : i32
    %c0_i32_1 = arith.constant 0 : i32
    return %c0_i32, %c0_i32_0 : i32, i32
  }
  func.func @transform_19(%arg0: i32) -> (i32, i32) {
    %c0_i32 = arith.constant 0 : i32
    %c0_i32_0 = arith.constant 0 : i32
    %c0_i32_1 = arith.constant 0 : i32
    return %c0_i32, %c0_i32_0 : i32, i32
  }
  func.func @transform_20(%arg0: i32) -> (i32, i32) {
    %c0_i32 = arith.constant 0 : i32
    %c0_i32_0 = arith.constant 0 : i32
    %c0_i32_1 = arith.constant 0 : i32
    return %c0_i32, %c0_i32_0 : i32, i32
  }
  func.func @transform_21(%arg0: i32) -> (i32, i32) {
    %c0_i32 = arith.constant 0 : i32
    %c0_i32_0 = arith.constant 0 : i32
    %c0_i32_1 = arith.constant 0 : i32
    return %c0_i32, %c0_i32_0 : i32, i32
  }
  func.func @transform_22(%arg0: i32) -> (i32, i32) {
    %c0_i32 = arith.constant 0 : i32
    %c0_i32_0 = arith.constant 0 : i32
    %c0_i32_1 = arith.constant 0 : i32
    return %c0_i32, %c0_i32_0 : i32, i32
  }
  func.func @transform_23(%arg0: i32) -> (i32, i32) {
    %c0_i32 = arith.constant 0 : i32
    %c0_i32_0 = arith.constant 0 : i32
    %c0_i32_1 = arith.constant 0 : i32
    return %c0_i32, %c0_i32_0 : i32, i32
  }
  func.func @transform_24(%arg0: i32) -> (i32, i32) {
    %c0_i32 = arith.constant 0 : i32
    %c0_i32_0 = arith.constant 0 : i32
    %c0_i32_1 = arith.constant 0 : i32
    return %c0_i32, %c0_i32_0 : i32, i32
  }
  func.func @transform_25(%arg0: i32) -> (i32, i32) {
    %c0_i32 = arith.constant 0 : i32
    %c0_i32_0 = arith.constant 0 : i32
    return %arg0, %c0_i32 : i32, i32
  }
}

</mosaic_0001>

<bundles_post_ra>
// kernel: tpu_custom_call.1
= control target key start
LH: loop header
LB: loop body
LE: loop exit
PB: predicated region body
PF: predicated region fallthrough
CT: control target
= control target key end

     0   :  { %s3064_s0 = inlined_call_operand.vmem [shape: f32[32,4], index: 0, kind: input, shape index: {}]   ;;  %s3065_s1 = inlined_call_operand.hbm [shape: f32[3,4,40], index: 1, kind: input, shape index: {}]   ;;  %s3066_s2 = inlined_call_operand.vmem [shape: f32[1,40], index: 2, kind: input, shape index: {}]   ;;  %s3067_s3 = inlined_call_operand.vmem [shape: f32[3,40,40], index: 3, kind: input, shape index: {}]   ;;  %s3068_s4 = inlined_call_operand.vmem [shape: f32[1,40], index: 4, kind: input, shape index: {}]   ;;  %s3069_s5 = inlined_call_operand.hbm [shape: f32[4,40], index: 5, kind: input, shape index: {}]   ;;  %s3070_s6 = inlined_call_operand.hbm [shape: f32[1,40], index: 6, kind: input, shape index: {}]   ;;  %s3071_s7 = inlined_call_operand.vmem [shape: f32[3,40,40], index: 7, kind: input, shape index: {}]   ;;  %s3072_s8 = inlined_call_operand.hbm [shape: f32[1,40], index: 8, kind: input, shape index: {}]   ;;  %s3073_s9 = inlined_call_operand.hbm [shape: f32[3,40,40], index: 9, kind: input, shape index: {}]   ;;  %s3074_s10 = inlined_call_operand.hbm [shape: f32[1,40], index: 10, kind: input, shape index: {}]   ;;  %s3075_s11 = inlined_call_operand.hbm [shape: f32[3,40,40], index: 11, kind: input, shape index: {}]   ;;  %s3076_s12 = inlined_call_operand.hbm [shape: f32[1,40], index: 12, kind: input, shape index: {}]   ;;  %s3077_s13 = inlined_call_operand.hbm [shape: f32[3,40,40], index: 13, kind: input, shape index: {}]   ;;  %s3078_s14 = inlined_call_operand.hbm [shape: f32[1,40], index: 14, kind: input, shape index: {}]   ;;  %s3079_s15 = inlined_call_operand.vmem [shape: f32[3,40,32], index: 15, kind: input, shape index: {}]   ;;  %s3080_s16 = inlined_call_operand.vmem [shape: f32[1,32], index: 16, kind: input, shape index: {}]   ;;  %s3081_s17 = inlined_call_operand.hbm [shape: f32[3,32,32], index: 17, kind: input, shape index: {}]   ;;  %s3082_s18 = inlined_call_operand.hbm [shape: f32[1,32], index: 18, kind: input, shape index: {}]   ;;  %s3083_s19 = inlined_call_operand.vmem [shape: f32[40,32], index: 19, kind: input, shape index: {}]   ;;  %s3084_s20 = inlined_call_operand.vmem [shape: f32[1,32], index: 20, kind: input, shape index: {}]   ;;  %s3085_s21 = inlined_call_operand.hbm [shape: f32[32,32], index: 21, kind: input, shape index: {}]   ;;  %s3086_s22 = inlined_call_operand.vmem [shape: f32[1,32], index: 22, kind: input, shape index: {}]   ;;  %s3087_s23 = inlined_call_operand.hbm [shape: f32[32,128], index: 23, kind: input, shape index: {}]   ;;  %s3088_s24 = inlined_call_operand.vmem [shape: f32[1,128], index: 24, kind: input, shape index: {}]   ;;  %s3089_s25 = inlined_call_operand.hbm [shape: f32[2,128], index: 25, kind: output, shape index: {}]  }
   0x1   :  { %3093 = sst [smem:[#allocation35_spill]] %s3064_s0 }
   0x2   :  { %3094 = sst [smem:[#allocation36_spill]] %s3065_s1 }
   0x3   :  { %3095 = sst [smem:[#allocation37_spill]] %s3066_s2 }
   0x4   :  { %3096 = sst [smem:[#allocation38_spill]] %s3067_s3 }
   0x5   :  { %3097 = sst [smem:[#allocation39_spill]] %s3068_s4 }
   0x6   :  { %3098 = sst [smem:[#allocation40_spill]] %s3069_s5 }
   0x7   :  { %3099 = sst [smem:[#allocation41_spill]] %s3070_s6 }
   0x8   :  { %3100 = sst [smem:[#allocation42_spill]] %s3071_s7 }
   0x9   :  { %3101 = sst [smem:[#allocation43_spill]] %s3072_s8 }
   0xa   :  { %3102 = sst [smem:[#allocation44_spill]] %s3073_s9 }
   0xb   :  { %3103 = sst [smem:[#allocation45_spill]] %s3089_s25 }
   0xc   :  { %30 = vsyncpa [#allocation3], 0 }
   0xd   :  { %31 = vsyncpa [#allocation6], 0 }
   0xe   :  { %32 = vsyncpa [#allocation9], 0 }
   0xf   :  { %33 = vsyncpa [#allocation12], 0 }
  0x10   :  { %34 = vsyncpa [#allocation15], 0 }
  0x11   :  { %35 = vsyncpa [#allocation18], 0 }
  0x12   :  { %36 = vsyncpa [#allocation21], 0 }
  0x13   :  { %37 = vsyncpa [#allocation24], 0  ;;  %s3104_s6 = sld [smem:[#allocation40_spill]] }
  0x19   :  { %s65_s30 = sshll.u32 %s3104_s6, 4  ;;  %s66_s30 = int_to_ptr.hbm [resolvable:$true] %s65_s30 }
  0x1a   :  { %38 = vsyncpa [#allocation4], 0  ;;  %s2400_s7 = smov [#allocation5]   ;;  %s3105_s8 = sld [smem:[#allocation43_spill]] }
  0x1b   :  { %s67_s3 = sshll.u32 %s2400_s7, 4  ;;  %s2401_s4 = smov [#allocation8]   ;;  %s68_s3 = int_to_ptr.vmem [resolvable:$true] %s67_s3 }
  0x1c   :  { %70 = dma.hbm_to_vmem [thread:$0]  %s66_s30, 64, %s68_s3, [#allocation6]  }
  0x1d   :  { %s91_s28 = sshll.u32 %s2401_s4, 4  ;;  %s113_s0 = sshll.u32 %s3074_s10, 4  ;;  %s92_s28 = int_to_ptr.vmem [resolvable:$true] %s91_s28  ;;  %s114_s0 = int_to_ptr.hbm [resolvable:$true] %s113_s0 }
  0x1e   :  { %s137_s6 = sshll.u32 %s3076_s12, 4  ;;  %s2402_s7 = smov [#allocation11]   ;;  %s138_s6 = int_to_ptr.hbm [resolvable:$true] %s137_s6 }
  0x1f   :  { %s115_s25 = sshll.u32 %s2402_s7, 4  ;;  %s2403_s30 = smov [#allocation14]   ;;  %s116_s25 = int_to_ptr.vmem [resolvable:$true] %s115_s25 }
  0x20   :  { %s89_s27 = sshll.u32 %s3105_s8, 4  ;;  %s139_s3 = sshll.u32 %s2403_s30, 4  ;;  %s90_s27 = int_to_ptr.hbm [resolvable:$true] %s89_s27  ;;  %s140_s3 = int_to_ptr.vmem [resolvable:$true] %s139_s3 }
  0x21   :  { %94 = dma.hbm_to_vmem [thread:$0]  %s90_s27, 16, %s92_s28, [#allocation9]  }
  0x22   :  { %118 = dma.hbm_to_vmem [thread:$0]  %s114_s0, 16, %s116_s25, [#allocation12]  }
  0x23   :  { %s161_s8 = sshll.u32 %s3078_s14, 4  ;;  %s189_s4 = sshll.u32 %s3082_s18, 4  ;;  %s162_s8 = int_to_ptr.hbm [resolvable:$true] %s161_s8  ;;  %s190_s4 = int_to_ptr.hbm [resolvable:$true] %s189_s4 }
  0x24   :  { %142 = dma.hbm_to_vmem [thread:$0]  %s138_s6, 16, %s140_s3, [#allocation15]  }
  0x25   :  { %s2404_s28 = smov [#allocation17]   ;;  %s2405_s9 = smov [#allocation20]  }
  0x26   :  { %s163_s12 = sshll.u32 %s2404_s28, 4  ;;  %s191_s25 = sshll.u32 %s2405_s9, 4  ;;  %s164_s12 = int_to_ptr.vmem [resolvable:$true] %s163_s12  ;;  %s192_s25 = int_to_ptr.vmem [resolvable:$true] %s191_s25 }
  0x27   :  { %166 = dma.hbm_to_vmem [thread:$0]  %s162_s8, 16, %s164_s12, [#allocation18]  }
  0x28   :  { %s3106_s29 = sld [smem:[#allocation36_spill]]  ;;  %s2406_s14 = smov [#allocation2]  }
  0x29   :  { %194 = dma.hbm_to_vmem [thread:$0]  %s190_s4, 16, %s192_s25, [#allocation21]  }
  0x2a   :  { %s47_s6 = sshll.u32 %s2406_s14, 4  ;;  %s3107_s18 = sld [smem:[#allocation41_spill]]  ;;  %s48_s6 = int_to_ptr.vmem [resolvable:$true] %s47_s6 }
  0x2b   :  { %s2407_s26 = smov 64   ;;  %s2408_s1 = smov 4  }
  0x2c   :  { %s2409_s8 = smov [#allocation7]   ;;  %s3108_s12 = sld [smem:[#allocation44_spill]] }
  0x2d   :  { %s78_s10 = sshll.u32 %s2409_s8, 4  ;;  %s2410_s4 = smov [#allocation10]   ;;  %s79_s10 = int_to_ptr.vmem [resolvable:$true] %s78_s10 }
  0x2e   :  { %s45_s2 = sshll.u32 %s3106_s29, 4  ;;  %s101_s25 = sshll.u32 %s2410_s4, 4  ;;  %s46_s2 = int_to_ptr.hbm [resolvable:$true] %s45_s2  ;;  %s102_s25 = int_to_ptr.vmem [resolvable:$true] %s101_s25 }
  0x2f   :  { %53 = dma.hbm_to_vmem [thread:$0]  %s46_s2, 192, %s48_s6, [#allocation3], %s2407_s26, %s2407_s26, %s2408_s1  }
  0x30   :  { %s76_s3 = sshll.u32 %s3107_s18, 4  ;;  %s123_s29 = sshll.u32 %s3075_s11, 4  ;;  %s77_s3 = int_to_ptr.hbm [resolvable:$true] %s76_s3  ;;  %s124_s29 = int_to_ptr.hbm [resolvable:$true] %s123_s29 }
  0x31   :  { %81 = dma.hbm_to_vmem [thread:$0]  %s77_s3, 16, %s79_s10, [#allocation6]  }
  0x32   :  { %s99_s9 = sshll.u32 %s3108_s12, 4  ;;  %s2411_s14 = smov 128   ;;  %s100_s9 = int_to_ptr.hbm [resolvable:$true] %s99_s9 }
  0x33   :  { %s2412_s7 = smov 8   ;;  %s2413_s2 = smov [#allocation13]  }
  0x34   :  { %107 = dma.hbm_to_vmem [thread:$0]  %s100_s9, 1920, %s102_s25, [#allocation9], %s2411_s14, %s2411_s14, %s2412_s7  }
  0x35   :  { %s125_s6 = sshll.u32 %s2413_s2, 4  ;;  %s147_s3 = sshll.u32 %s3077_s13, 4  ;;  %s126_s6 = int_to_ptr.vmem [resolvable:$true] %s125_s6  ;;  %s148_s3 = int_to_ptr.hbm [resolvable:$true] %s147_s3 }
  0x36   :  { %131 = dma.hbm_to_vmem [thread:$0]  %s124_s29, 1920, %s126_s6, [#allocation12], %s2411_s14, %s2411_s14, %s2412_s7  }
  0x37   :  { %s175_s1 = sshll.u32 %s3081_s17, 4  ;;  %s2414_s8 = smov [#allocation16]   ;;  %s176_s1 = int_to_ptr.hbm [resolvable:$true] %s175_s1 }
  0x38   :  { %s149_s10 = sshll.u32 %s2414_s8, 4  ;;  %s2415_s27 = smov [#allocation19]   ;;  %s150_s10 = int_to_ptr.vmem [resolvable:$true] %s149_s10 }
  0x39   :  { %155 = dma.hbm_to_vmem [thread:$0]  %s148_s3, 1920, %s150_s10, [#allocation15], %s2411_s14, %s2411_s14, %s2412_s7  }
  0x3a   :  { %s177_s13 = sshll.u32 %s2415_s27, 4  ;;  %s203_s9 = sshll.u32 %s3085_s21, 4  ;;  %s178_s13 = int_to_ptr.vmem [resolvable:$true] %s177_s13  ;;  %s204_s9 = int_to_ptr.hbm [resolvable:$true] %s203_s9 }
  0x3b   :  { %183 = dma.hbm_to_vmem [thread:$0]  %s176_s1, 1536, %s178_s13, [#allocation18], %s2411_s14, %s2411_s14, %s2412_s7  }
  0x3c   :  { %s218_s25 = sshll.u32 %s3087_s23, 4  ;;  %s2416_s5 = smov [#allocation22]   ;;  %s219_s25 = int_to_ptr.hbm [resolvable:$true] %s218_s25 }
  0x3d   :  { %s205_s0 = sshll.u32 %s2416_s5, 4  ;;  %s2417_s29 = smov [#allocation23]   ;;  %s206_s0 = int_to_ptr.vmem [resolvable:$true] %s205_s0 }
  0x3e   :  { %211 = dma.hbm_to_vmem [thread:$0]  %s204_s9, 512, %s206_s0, [#allocation21], %s2411_s14, %s2411_s14, %s2412_s7  }
  0x3f   :  { %s220_s21 = sshll.u32 %s2417_s29, 4  ;;  %s221_s21 = int_to_ptr.vmem [resolvable:$true] %s220_s21 }
  0x40   :  { %226 = dma.hbm_to_vmem [thread:$0]  %s219_s25, 512, %s221_s21, [#allocation24], %s2411_s14, %s2411_s14, %s2412_s7  }
  0x41   :  { %2382 = dma.done.wait [#allocation3], 192  }
  0x42   :  { %2383 = vsyncadd [#allocation3], 4294967104 }
  0x43   :  { %2384 = dma.done.wait [#allocation6], 80  }
  0x44   :  { %2385 = vsyncadd [#allocation6], 4294967216 }
  0x45   :  { %2386 = dma.done.wait [#allocation9], 1936  }
  0x46   :  { %2387 = vsyncadd [#allocation9], 4294965360 }
  0x47   :  { %2388 = dma.done.wait [#allocation12], 1936  }
  0x48   :  { %2389 = vsyncadd [#allocation12], 4294965360 }
  0x49   :  { %2390 = dma.done.wait [#allocation15], 1936  }
  0x4a   :  { %2391 = vsyncadd [#allocation15], 4294965360 }
  0x4b   :  { %2392 = dma.done.wait [#allocation18], 1552  }
  0x4c   :  { %2393 = vsyncadd [#allocation18], 4294965744 }
  0x4d   :  { %2394 = dma.done.wait [#allocation21], 528  }
  0x4e   :  { %2395 = vsyncadd [#allocation21], 4294966768 }
  0x4f   :  { %2396 = dma.done.wait [#allocation24], 512  }
  0x50   :  { %2397 = vsyncadd [#allocation24], 4294966784  ;;  %v289_v0 = vlaneseq  ;;  %vm350_vm0 = vcmask 1043456   ;;  %vm337_vm1 = vcmask 31744   ;;  %v428_v2 = vld [vmem:[#allocation2 + $0x8] sm:$0xf] }
  0x51   :  { %s3109_s7 = sld [smem:[#allocation35_spill]]  ;;  %v336_v4 = vld [vmem:[#allocation2 + $0x4] sm:$0xf]  ;;  %1876 = vmatpush.msk.msra.mxu2 %vm350_vm0, %v428_v2  ;;  %v317_v5 = vld [vmem:[#allocation2] sm:$0xf]  ;;  %vm532_vm7 = vcmask 326656  }
  0x52   :  { %v2610_v1 = vshrl.u32 %v289_v0, 7  ;;  %1866 = vmatpush.msk.msra.mxu0 %vm350_vm0, %v336_v4  ;;  %1871 = vmatpush.msk.msra.mxu1 %vm350_vm0, %v317_v5  ;;  %s3110_s8 = sld [smem:[#allocation38_spill]]  ;;  %v686_v35 = vld [vmem:[#allocation5] sm:$0xf] }
  0x53   :  { %1903 = vmatpush.msk.msrb.mxu2 %vm350_vm0, %v686_v35  ;;  %s3111_s10 = sld [smem:[#allocation37_spill]] }
  0x54   :  { %vm304_vm2 = vcmp.lt.s32.totalorder %v2610_v1, 2  ;;  %vm322_vm3 = vcmp.lt.s32.totalorder %v2610_v1, 1  ;;  %vm292_vm4 = vcmp.ge.s32.totalorder %v2610_v1, 1  ;;  %vm294_vm5 = vcmp.ge.s32.totalorder %v2610_v1, 2  ;;  %s3112_s25 = sld [smem:[#allocation42_spill]] }
  0x55   :  { %s3113_s5 = sld [smem:[#allocation39_spill]]  ;;  %vm731_vm15 = vcmp.lt.s32.totalorder %v2610_v1, 4  ;;  %vm296_vm0 = vcmp.ge.s32.totalorder %v2610_v1, 4  ;;  %v1969_v1 = vld [vmem:[%s3079_s15 + $0x60] sm:$0xff] }
  0x56   :  { %s3114_s12 = sld [smem:[#allocation45_spill]] }
  0x57   :  { %v285_v3 = vld [vmem:[%s3109_s7] sm:$0xff]  ;;  %v2621_v6 = vld [vmem:[%s3109_s7 + $0x18] sm:$0xff]  ;;  %v286_v11 = vld [vmem:[%s3109_s7 + $0x8] sm:$0xff] }
  0x58   :  { %v318_v7 = vrot.slane %v285_v3, 7  ;;  %v300_v8 = vrot.slane %v285_v3, 6  ;;  %1877 = vmatmul.msk.f32.vlgmr.msra.gmra.mxu2 %vm337_vm1, %v285_v3  ;;  %v321_v9 = vrot.slane %v2621_v6, 7  ;;  %v303_v10 = vrot.slane %v2621_v6, 6  ;;  %v287_v18 = vld [vmem:[%s3109_s7 + $0x10] sm:$0xff]  ;;  %v1897_v30 = vld [vmem:[%s3110_s8 + $0x68] sm:$0xff] }
  0x59   :  { %v319_v16 = vrot.slane %v286_v11, 7  ;;  %v301_v17 = vrot.slane %v286_v11, 6  ;;  %v320_v21 = vrot.slane %v287_v18, 7  ;;  %v302_v22 = vrot.slane %v287_v18, 6  ;;  %v1898_v29 = vld [vmem:[%s3110_s8 + $0x70] sm:$0xff]  ;;  %v1896_v31 = vld [vmem:[%s3110_s8 + $0x60] sm:$0xff] }
  0x5a   :  { %v326_v12 = vsel %vm322_vm3, %v321_v9, %v318_v7  ;;  %v308_v13 = vsel %vm304_vm2, %v303_v10, %v300_v8  ;;  %644 = vmatpush.msrb.mxu1 %v1898_v29  ;;  %v1895_v32 = vld [vmem:[%s3110_s8 + $0x58] sm:$0xff]  ;;  %v1894_v33 = vld [vmem:[%s3110_s8 + $0x50] sm:$0xff]  ;;  %v513_v34 = vld [vmem:[%s3110_s8 + $0x20] sm:$0xff] }
  0x5b   :  { %v331_v14 = vsel %vm292_vm4, %v326_v12, 0.0  ;;  %v313_v15 = vsel %vm294_vm5, %v308_v13, 0.0  ;;  %v325_v19 = vsel %vm322_vm3, %v318_v7, %v319_v16  ;;  %v307_v20 = vsel %vm304_vm2, %v300_v8, %v301_v17  ;;  %597 = vmatpush.msrb.mxu0 %v513_v34  ;;  %v512_v36 = vld [vmem:[%s3110_s8 + $0x18] sm:$0xff]  ;;  %v511_v37 = vld [vmem:[%s3110_s8 + $0x10] sm:$0xff]  ;;  %v1885_v38 = vld [vmem:[%s3110_s8 + $0x48] sm:$0xff] }
  0x5c   :  { %1867 = vmatmul.msk.f32.vlgmr.msra.gmra.mxu0 %vm337_vm1, %v331_v14  ;;  %1872 = vmatmul.msk.f32.vlgmr.msra.gmra.mxu1 %vm337_vm1, %v313_v15  ;;  %v324_v23 = vsel %vm322_vm3, %v319_v16, %v320_v21  ;;  %v306_v24 = vsel %vm304_vm2, %v301_v17, %v302_v22  ;;  %v323_v27 = vsel %vm322_vm3, %v320_v21, %v321_v9  ;;  %v1884_v39 = vld [vmem:[%s3110_s8 + $0x40] sm:$0xff]  ;;  %v510_v40 = vld [vmem:[%s3110_s8 + $0x8] sm:$0xff]  ;;  %v1883_v41 = vld [vmem:[%s3110_s8 + $0x38] sm:$0xff]  ;;  %s1849_s9 = sshll.u32 %s3114_s12, 4  ;;  %s1850_s9 = int_to_ptr.hbm [resolvable:$true] %s1849_s9 }
  0x5d   :  { %v333_v25 = vsel %vm292_vm4, %v324_v23, 0.0  ;;  %v315_v26 = vsel %vm294_vm5, %v306_v24, 0.0  ;;  %v305_v28 = vsel %vm304_vm2, %v302_v22, %v303_v10  ;;  %645 = vmatpush.msrb.mxu1 %v1897_v30  ;;  %598 = vmatpush.msrb.mxu0 %v512_v36  ;;  %v2010_v45 = vld [vmem:[%s3111_s10] ss:$0 sm:$0xff]  ;;  %v1882_v47 = vld [vmem:[%s3110_s8 + $0x30] sm:$0xff]  ;;  %v1881_v48 = vld [vmem:[%s3110_s8 + $0x28] sm:$0xff] }
  0x5e   :  { %556 = vmatpush.msra.mxu3 %v1885_v38  ;;  %v509_v49 = vld [vmem:[%s3110_s8] sm:$0xff]  ;;  %v1925_v35 = vld [vmem:[%s3112_s25 + $0x70] sm:$0xff]  ;;  %v1924_v36 = vld [vmem:[%s3112_s25 + $0x68] sm:$0xff]  ;;  %s2419_s10 = smov [#allocation25]  }
  0x5f   :  { %646 = vmatpush.msrb.mxu1 %v1896_v31  ;;  %599 = vmatpush.msrb.mxu0 %v511_v37  ;;  %v1923_v37 = vld [vmem:[%s3112_s25 + $0x60] sm:$0xff]  ;;  %v1922_v38 = vld [vmem:[%s3112_s25 + $0x58] sm:$0xff]  ;;  %s1847_s27 = sshll.u32 %s2419_s10, 4  ;;  %s1848_s27 = int_to_ptr.vmem [resolvable:$true] %s1847_s27 }
  0x60   :  { %1878 = vmatmul.msk.f32.gmra.mxu2 %vm337_vm1, %v286_v11  ;;  %557 = vmatpush.msra.mxu3 %v1884_v39  ;;  %v1921_v39 = vld [vmem:[%s3112_s25 + $0x50] sm:$0xff] }
  0x61   :  { %647 = vmatpush.msrb.mxu1 %v1895_v32  ;;  %600 = vmatpush.msrb.mxu0 %v510_v40  ;;  %v1912_v40 = vld [vmem:[%s3112_s25 + $0x48] sm:$0xff] }
  0x62   :  { %558 = vmatpush.msra.mxu3 %v1883_v41  ;;  %v748_v41 = vld [vmem:[%s3112_s25 + $0x20] sm:$0xff] }
  0x63   :  { %648 = vmatpush.msrb.mxu1 %v1894_v33  ;;  %601 = vmatpush.msrb.mxu0 %v509_v49  ;;  %v1909_v49 = vld [vmem:[%s3112_s25 + $0x30] sm:$0xff] }
  0x64   :  { %1868 = vmatmul.msk.f32.gmra.mxu0 %vm337_vm1, %v325_v19  ;;  %1873 = vmatmul.msk.f32.gmra.mxu1 %vm337_vm1, %v307_v20 }
  0x65   :  { %559 = vmatpush.msra.mxu3 %v1882_v47  ;;  %878 = vmatpush.msra.mxu1 %v1925_v35 }
  0x66   :  { %831 = vmatpush.msra.mxu0 %v748_v41 }
  0x67   :  { %560 = vmatpush.msra.mxu3 %v1881_v48  ;;  %879 = vmatpush.msra.mxu1 %v1924_v36  ;;  %v746_v48 = vld [vmem:[%s3112_s25 + $0x10] sm:$0xff] }
  0x68   :  { %1879 = vmatmul.msk.f32.gmra.mxu2 %vm337_vm1, %v287_v18 }
  0x69   :  { %880 = vmatpush.msra.mxu1 %v1923_v37  ;;  %790 = vmatpush.msrb.mxu3 %v1912_v40 }
  0x6b   :  { %881 = vmatpush.msra.mxu1 %v1922_v38 }
  0x6c   :  { %1869 = vmatmul.msk.f32.gmra.mxu0 %vm337_vm1, %v333_v25  ;;  %1874 = vmatmul.msk.f32.gmra.mxu1 %vm337_vm1, %v315_v26 }
  0x6d   :  { %882 = vmatpush.msra.mxu1 %v1921_v39 }
  0x70   :  { %1880 = vmatmul.msk.f32.gmra.mxu2 %vm337_vm1, %v2621_v6 }
  0x74   :  { %1870 = vmatmul.msk.f32.gmra.mxu0 %vm337_vm1, %v323_v27  ;;  %1875 = vmatmul.msk.f32.gmra.mxu1 %vm337_vm1, %v305_v28 }
  0x78   :  { %1904 = vmatmul.msk.f32.vlgmr.msrb.gmra.mxu2 %vm337_vm1, %v285_v3 }
  0x80   :  { %1905 = vmatmul.msk.f32.gmra.mxu2 %vm337_vm1, %v286_v11 }
  0x88   :  { %1906 = vmatmul.msk.f32.gmra.mxu2 %vm337_vm1, %v287_v18 }
  0x90   :  { %1907 = vmatmul.msk.f32.gmra.mxu2 %vm337_vm1, %v2621_v6 }
  0xd9   :  { %v371_v42 = vpop.f32.mrf.mxu0  ;;  %v415_v43 = vpop.f32.mrf.mxu1 }
  0xda   :  { %v416_v44 = vadd.f32 %v415_v43, %v371_v42  ;;  %v1911_v42 = vld [vmem:[%s3112_s25 + $0x40] sm:$0xff]  ;;  %v1910_v43 = vld [vmem:[%s3112_s25 + $0x38] sm:$0xff] }
  0xdb   :  { %v461_v46 = vpop.f32.mrf.mxu2  ;;  %791 = vmatpush.msrb.mxu3 %v1911_v42 }
  0xdc   :  { %v473_v50 = vadd.f32 %v461_v46, %v416_v44  ;;  %v747_v44 = vld [vmem:[%s3112_s25 + $0x18] sm:$0xff] }
  0xdd   :  { %792 = vmatpush.msrb.mxu3 %v1910_v43  ;;  %832 = vmatpush.msra.mxu0 %v747_v44 }
  0xde   :  { %v481_v51 = vadd.f32 %v2010_v45, %v473_v50 }
  0xdf   :  { %833 = vmatpush.msra.mxu0 %v746_v48  ;;  %793 = vmatpush.msrb.mxu3 %v1909_v49 }
  0xe0   :  { %v489_v52 = vmul.f32 0.01, %v481_v51  ;;  %vm485_vm6 = vcmp.gt.f32.partialorder %v481_v51, 0.0 }
  0xe1   :  { %v374_v53 = vpop.f32.mrf.mxu0  ;;  %v418_v54 = vpop.f32.mrf.mxu1 }
  0xe2   :  { %v419_v55 = vadd.f32 %v418_v54, %v374_v53  ;;  %v493_v56 = vsel %vm485_vm6, %v481_v51, %v489_v52  ;;  %v2011_v52 = vld [vmem:[%s3113_s5] ss:$0 sm:$0xff]  ;;  %v2012_v53 = vld [vmem:[#allocation7] ss:$0 sm:$0xff] }
  0xe3   :  { %v464_v57 = vpop.f32.mrf.mxu2  ;;  %1899 = vmatmul.msk.f32.vlgmr.msrb.gmra.mxu1 %vm532_vm7, %v493_v56  ;;  %v497_v15 = vrot.slane %v493_v56, 6  ;;  %v514_v16 = vrot.slane %v493_v56, 7  ;;  %v1908_v56 = vld [vmem:[%s3112_s25 + $0x28] sm:$0xff] }
  0xe4   :  { %v474_v58 = vadd.f32 %v464_v57, %v419_v55  ;;  %v745_v57 = vld [vmem:[%s3112_s25 + $0x8] sm:$0xff]  ;;  %794 = vmatpush.msrb.mxu3 %v1908_v56 }
  0xe5   :  { %834 = vmatpush.msra.mxu0 %v745_v57  ;;  %v1039_v56 = vld [vmem:[#allocation10 + $0x58] sm:$0xff]  ;;  %v954_v57 = vld [vmem:[#allocation10 + $0x48] sm:$0xff] }
  0xe6   :  { %v482_v59 = vadd.f32 %v2010_v45, %v474_v58  ;;  %v744_v58 = vld [vmem:[%s3112_s25] sm:$0xff]  ;;  %978 = vmatpush.msra.mxu2 %v954_v57 }
  0xe7   :  { %835 = vmatpush.msra.mxu0 %v744_v58  ;;  %v936_v58 = vld [vmem:[#allocation10 + $0x20] sm:$0xff] }
  0xe8   :  { %vm486_vm8 = vcmp.gt.f32.partialorder %v482_v59, 0.0  ;;  %v490_v60 = vmul.f32 0.01, %v482_v59 }
  0xe9   :  { %v377_v61 = vpop.f32.mrf.mxu0  ;;  %v421_v62 = vpop.f32.mrf.mxu1 }
  0xea   :  { %v422_v63 = vadd.f32 %v421_v62, %v377_v61  ;;  %v494_v0 = vsel %vm486_vm8, %v482_v59, %v490_v60 }
  0xeb   :  { %v467_v2 = vpop.f32.mrf.mxu2  ;;  %1900 = vmatmul.msk.f32.gmra.mxu1 %vm532_vm7, %v494_v0  ;;  %v498_v23 = vrot.slane %v494_v0, 6  ;;  %v515_v24 = vrot.slane %v494_v0, 7 }
  0xec   :  { %v475_v3 = vadd.f32 %v467_v2, %v422_v63 }
  0xed   :  { %v520_v25 = vsel %vm322_vm3, %v514_v16, %v515_v24  ;;  %v503_v26 = vsel %vm304_vm2, %v497_v15, %v498_v23 }
  0xee   :  { %v483_v4 = vadd.f32 %v2010_v45, %v475_v3 }
  0xf0   :  { %vm487_vm9 = vcmp.gt.f32.partialorder %v483_v4, 0.0  ;;  %v491_v5 = vmul.f32 0.01, %v483_v4 }
  0xf1   :  { %v380_v6 = vpop.f32.mrf.mxu0  ;;  %v424_v7 = vpop.f32.mrf.mxu1 }
  0xf2   :  { %v425_v8 = vadd.f32 %v424_v7, %v380_v6  ;;  %v495_v9 = vsel %vm487_vm9, %v483_v4, %v491_v5 }
  0xf3   :  { %v470_v10 = vpop.f32.mrf.mxu2  ;;  %1901 = vmatmul.msk.f32.gmra.mxu1 %vm532_vm7, %v495_v9  ;;  %v499_v27 = vrot.slane %v495_v9, 6  ;;  %v516_v28 = vrot.slane %v495_v9, 7 }
  0xf4   :  { %v476_v11 = vadd.f32 %v470_v10, %v425_v8 }
  0xf5   :  { %v519_v29 = vsel %vm322_vm3, %v515_v24, %v516_v28  ;;  %v502_v30 = vsel %vm304_vm2, %v498_v23, %v499_v27 }
  0xf6   :  { %v484_v12 = vadd.f32 %v2010_v45, %v476_v11  ;;  %v524_v31 = vsel %vm292_vm4, %v519_v29, 0.0  ;;  %v507_v32 = vsel %vm294_vm5, %v502_v30, 0.0 }
  0xf8   :  { %vm488_vm10 = vcmp.gt.f32.partialorder %v484_v12, 0.0  ;;  %v492_v13 = vmul.f32 0.01, %v484_v12 }
  0xfa   :  { %v496_v14 = vsel %vm488_vm10, %v484_v12, %v492_v13 }
  0xfb   :  { %v500_v17 = vrot.slane %v496_v14, 6  ;;  %v517_v18 = vrot.slane %v496_v14, 7  ;;  %1902 = vmatmul.msk.f32.gmra.mxu1 %vm532_vm7, %v496_v14  ;;  %v711_v47 = vpop.f32.mrf.mxu2 }
  0xfc   :  { %v712_v61 = vadd.f32 %v2012_v53, %v711_v47 }
  0xfd   :  { %v521_v19 = vsel %vm322_vm3, %v517_v18, %v514_v16  ;;  %v504_v20 = vsel %vm304_vm2, %v500_v17, %v497_v15  ;;  %v518_v33 = vsel %vm322_vm3, %v516_v28, %v517_v18  ;;  %v501_v34 = vsel %vm304_vm2, %v499_v27, %v500_v17 }
  0xfe   :  { %v522_v21 = vsel %vm292_vm4, %v521_v19, 0.0  ;;  %v505_v22 = vsel %vm294_vm5, %v504_v20, 0.0 }
  0xff   :  { %1886 = vmatmul.msk.f32.vlgmr.msra.gmra.mxu3 %vm532_vm7, %v522_v21  ;;  %1890 = vmatmul.msk.f32.vlgmr.msrb.gmra.mxu0 %vm532_vm7, %v505_v22 }
 0x100   :  { %1019 = vmatpush.msra.mxu3 %v936_v58 }
 0x103   :  { %v714_v63 = vpop.f32.mrf.mxu2 }
 0x104   :  { %v715_v8 = vadd.f32 %v2012_v53, %v714_v63  ;;  %v934_v63 = vld [vmem:[#allocation10 + $0x10] sm:$0xff] }
 0x107   :  { %1887 = vmatmul.msk.f32.gmra.mxu3 %vm532_vm7, %v520_v25  ;;  %1891 = vmatmul.msk.f32.gmra.mxu0 %vm532_vm7, %v503_v26 }
 0x10b   :  { %v717_v14 = vpop.f32.mrf.mxu2 }
 0x10c   :  { %v718_v18 = vadd.f32 %v2012_v53, %v717_v14 }
 0x10f   :  { %1888 = vmatmul.msk.f32.gmra.mxu3 %vm532_vm7, %v524_v31  ;;  %1892 = vmatmul.msk.f32.gmra.mxu0 %vm532_vm7, %v507_v32 }
 0x113   :  { %v720_v27 = vpop.f32.mrf.mxu2 }
 0x114   :  { %v721_v29 = vadd.f32 %v2012_v53, %v720_v27  ;;  %v1042_v53 = vld [vmem:[#allocation10 + $0x70] sm:$0xff] }
 0x115   :  { %1066 = vmatpush.msrb.mxu0 %v1042_v53 }
 0x117   :  { %1889 = vmatmul.msk.f32.gmra.mxu3 %vm532_vm7, %v518_v33  ;;  %1893 = vmatmul.msk.f32.gmra.mxu0 %vm532_vm7, %v501_v34 }
 0x160   :  { %v650_v46 = vpop.f32.mrf.mxu1 }
 0x168   :  { %v653_v60 = vpop.f32.mrf.mxu1 }
 0x170   :  { %v656_v10 = vpop.f32.mrf.mxu1 }
 0x178   :  { %v659_v24 = vpop.f32.mrf.mxu1 }
 0x17c   :  { %v603_v45 = vpop.f32.mrf.mxu0 }
 0x182   :  { %v562_v50 = vpop.f32.mrf.mxu3 }
 0x183   :  { %v604_v51 = vadd.f32 %v603_v45, %v562_v50 }
 0x184   :  { %v606_v55 = vpop.f32.mrf.mxu0 }
 0x185   :  { %v662_v54 = vadd.f32 %v650_v46, %v604_v51 }
 0x187   :  { %v670_v59 = vadd.f32 %v2011_v52, %v662_v54  ;;  %v1041_v54 = vld [vmem:[#allocation10 + $0x68] sm:$0xff] }
 0x188   :  { %1067 = vmatpush.msrb.mxu0 %v1041_v54 }
 0x189   :  { %vm674_vm11 = vcmp.gt.f32.partialorder %v670_v59, 0.0  ;;  %v678_v62 = vmul.f32 0.01, %v670_v59 }
 0x18a   :  { %v565_v0 = vpop.f32.mrf.mxu3 }
 0x18b   :  { %v682_v2 = vsel %vm674_vm11, %v670_v59, %v678_v62  ;;  %v607_v3 = vadd.f32 %v606_v55, %v565_v0  ;;  %v1040_v55 = vld [vmem:[#allocation10 + $0x60] sm:$0xff]  ;;  %v1038_v59 = vld [vmem:[#allocation10 + $0x50] sm:$0xff]  ;;  %v952_v62 = vld [vmem:[#allocation10 + $0x38] sm:$0xff] }
 0x18c   :  { %v2810_v4 = vadd.f32 %v712_v61, %v682_v2  ;;  %v609_v7 = vpop.f32.mrf.mxu0  ;;  %1068 = vmatpush.msrb.mxu0 %v1040_v55  ;;  %v935_v61 = vld [vmem:[#allocation10 + $0x18] sm:$0xff] }
 0x18d   :  { %v663_v5 = vadd.f32 %v653_v60, %v607_v3  ;;  %v953_v60 = vld [vmem:[#allocation10 + $0x40] sm:$0xff]  ;;  %1020 = vmatpush.msra.mxu3 %v935_v61  ;;  %v951_v3 = vld [vmem:[#allocation10 + $0x30] sm:$0xff] }
 0x18e   :  { %1926 = vmatmul.msk.f32.vlgmr.msra.gmra.mxu1 %vm532_vm7, %v2810_v4  ;;  %v727_v33 = vrot.slane %v2810_v4, 4  ;;  %v749_v35 = vrot.slane %v2810_v4, 6  ;;  %1069 = vmatpush.msrb.mxu0 %v1039_v56 }
 0x18f   :  { %v671_v6 = vadd.f32 %v2011_v52, %v663_v5  ;;  %979 = vmatpush.msra.mxu2 %v953_v60  ;;  %1021 = vmatpush.msra.mxu3 %v934_v63  ;;  %v933_v5 = vld [vmem:[#allocation10 + $0x8] sm:$0xff]  ;;  %v1123_v63 = vld [vmem:[#allocation13 + $0x18] sm:$0xff] }
 0x190   :  { %1070 = vmatpush.msrb.mxu0 %v1038_v59 }
 0x191   :  { %vm675_vm12 = vcmp.gt.f32.partialorder %v671_v6, 0.0  ;;  %v679_v9 = vmul.f32 0.01, %v671_v6  ;;  %980 = vmatpush.msra.mxu2 %v952_v62  ;;  %1022 = vmatpush.msra.mxu3 %v933_v5  ;;  %v1124_v62 = vld [vmem:[#allocation13 + $0x20] sm:$0xff]  ;;  %v1230_v5 = vld [vmem:[#allocation13 + $0x70] sm:$0xff] }
 0x192   :  { %v568_v11 = vpop.f32.mrf.mxu3 }
 0x193   :  { %v683_v12 = vsel %vm675_vm12, %v671_v6, %v679_v9  ;;  %v610_v13 = vadd.f32 %v609_v7, %v568_v11  ;;  %v950_v6 = vld [vmem:[#allocation10 + $0x28] sm:$0xff]  ;;  %981 = vmatpush.msra.mxu2 %v951_v3  ;;  %v932_v7 = vld [vmem:[#allocation10] sm:$0xff] }
 0x194   :  { %v2814_v15 = vadd.f32 %v715_v8, %v683_v12  ;;  %v612_v20 = vpop.f32.mrf.mxu0  ;;  %1023 = vmatpush.msra.mxu3 %v932_v7  ;;  %v1120_v3 = vld [vmem:[#allocation13] sm:$0xff]  ;;  %v1229_v7 = vld [vmem:[#allocation13 + $0x68] sm:$0xff] }
 0x195   :  { %v664_v16 = vadd.f32 %v656_v10, %v610_v13  ;;  %982 = vmatpush.msra.mxu2 %v950_v6  ;;  %v2013_v10 = vld [vmem:[#allocation8] ss:$0 sm:$0xff]  ;;  %v2418_v6 = vmov 0.0  }
 0x196   :  { %1927 = vmatmul.msk.f32.gmra.mxu1 %vm532_vm7, %v2814_v15  ;;  %v750_v41 = vrot.slane %v2814_v15, 6  ;;  %v728_v42 = vrot.slane %v2814_v15, 4 }
 0x197   :  { %v672_v17 = vadd.f32 %v2011_v52, %v664_v16  ;;  %1207 = vmatpush.msrb.mxu2 %v1124_v62  ;;  %v1304_v62 = vld [vmem:[#allocation16 + $0x20] sm:$0xff] }
 0x198   :  { %v755_v43 = vsel %vm304_vm2, %v749_v35, %v750_v41  ;;  %v734_v44 = vsel %vm731_vm15, %v727_v33, %v728_v42 }
 0x199   :  { %vm676_vm13 = vcmp.gt.f32.partialorder %v672_v17, 0.0  ;;  %v680_v19 = vmul.f32 0.01, %v672_v17  ;;  %1208 = vmatpush.msrb.mxu2 %v1123_v63  ;;  %v1303_v63 = vld [vmem:[#allocation16 + $0x18] sm:$0xff] }
 0x19a   :  { %v571_v21 = vpop.f32.mrf.mxu3 }
 0x19b   :  { %v684_v22 = vsel %vm676_vm13, %v672_v17, %v680_v19  ;;  %v613_v23 = vadd.f32 %v612_v20, %v571_v21 }
 0x19c   :  { %v2818_v25 = vadd.f32 %v718_v18, %v684_v22 }
 0x19d   :  { %v665_v26 = vadd.f32 %v659_v24, %v613_v23 }
 0x19e   :  { %1928 = vmatmul.msk.f32.gmra.mxu1 %vm532_vm7, %v2818_v25  ;;  %v751_v45 = vrot.slane %v2818_v25, 6  ;;  %v729_v46 = vrot.slane %v2818_v25, 4 }
 0x19f   :  { %v673_v28 = vadd.f32 %v2011_v52, %v665_v26 }
 0x1a0   :  { %v754_v47 = vsel %vm304_vm2, %v750_v41, %v751_v45  ;;  %v733_v48 = vsel %vm731_vm15, %v728_v42, %v729_v46 }
 0x1a1   :  { %vm677_vm14 = vcmp.gt.f32.partialorder %v673_v28, 0.0  ;;  %v681_v30 = vmul.f32 0.01, %v673_v28  ;;  %v759_v49 = vsel %vm294_vm5, %v754_v47, 0.0  ;;  %v742_v50 = vsel %vm296_vm0, %v733_v48, 0.0 }
 0x1a3   :  { %v685_v31 = vsel %vm677_vm14, %v673_v28, %v681_v30 }
 0x1a4   :  { %v2822_v32 = vadd.f32 %v721_v29, %v685_v31 }
 0x1a6   :  { %v730_v34 = vrot.slane %v2822_v32, 4  ;;  %1929 = vmatmul.msk.f32.gmra.mxu1 %vm532_vm7, %v2822_v32  ;;  %v752_v36 = vrot.slane %v2822_v32, 6 }
 0x1a8   :  { %v756_v37 = vsel %vm304_vm2, %v752_v36, %v749_v35  ;;  %v735_v38 = vsel %vm731_vm15, %v730_v34, %v727_v33  ;;  %v753_v51 = vsel %vm304_vm2, %v751_v45, %v752_v36  ;;  %v732_v52 = vsel %vm731_vm15, %v729_v46, %v730_v34 }
 0x1a9   :  { %v757_v39 = vsel %vm294_vm5, %v756_v37, 0.0  ;;  %v740_v40 = vsel %vm296_vm0, %v735_v38, 0.0 }
 0x1aa   :  { %1913 = vmatmul.msk.f32.vlgmr.msrb.gmra.mxu3 %vm532_vm7, %v757_v39  ;;  %1917 = vmatmul.msk.f32.vlgmr.msra.gmra.mxu0 %vm532_vm7, %v740_v40 }
 0x1ab   :  { %1254 = vmatpush.msrb.mxu3 %v1230_v5  ;;  %v1410_v5 = vld [vmem:[#allocation16 + $0x70] sm:$0xff] }
 0x1ad   :  { %1255 = vmatpush.msrb.mxu3 %v1229_v7  ;;  %v1409_v7 = vld [vmem:[#allocation16 + $0x68] sm:$0xff] }
 0x1b2   :  { %1914 = vmatmul.msk.f32.gmra.mxu3 %vm532_vm7, %v755_v43  ;;  %1918 = vmatmul.msk.f32.gmra.mxu0 %vm532_vm7, %v734_v44 }
 0x1ba   :  { %1915 = vmatmul.msk.f32.gmra.mxu3 %vm532_vm7, %v759_v49  ;;  %1919 = vmatmul.msk.f32.gmra.mxu0 %vm532_vm7, %v742_v50 }
 0x1c2   :  { %1916 = vmatmul.msk.f32.gmra.mxu3 %vm532_vm7, %v753_v51  ;;  %1920 = vmatmul.msk.f32.gmra.mxu0 %vm532_vm7, %v732_v52 }
 0x20b   :  { %v884_v2 = vpop.f32.mrf.mxu1 }
 0x213   :  { %v887_v14 = vpop.f32.mrf.mxu1 }
 0x21b   :  { %v890_v24 = vpop.f32.mrf.mxu1 }
 0x223   :  { %v893_v37 = vpop.f32.mrf.mxu1 }
 0x227   :  { %v837_v0 = vpop.f32.mrf.mxu0 }
 0x22d   :  { %v796_v8 = vpop.f32.mrf.mxu3 }
 0x22e   :  { %v838_v9 = vadd.f32 %v837_v0, %v796_v8  ;;  %v1122_v0 = vld [vmem:[#allocation13 + $0x10] sm:$0xff]  ;;  %v1228_v8 = vld [vmem:[#allocation13 + $0x60] sm:$0xff] }
 0x22f   :  { %v840_v12 = vpop.f32.mrf.mxu0  ;;  %1209 = vmatpush.msrb.mxu2 %v1122_v0  ;;  %1256 = vmatpush.msrb.mxu3 %v1228_v8  ;;  %v1302_v0 = vld [vmem:[#allocation16 + $0x10] sm:$0xff]  ;;  %v1408_v8 = vld [vmem:[#allocation16 + $0x60] sm:$0xff] }
 0x230   :  { %v896_v11 = vadd.f32 %v884_v2, %v838_v9  ;;  %v1121_v2 = vld [vmem:[#allocation13 + $0x8] sm:$0xff]  ;;  %v1227_v9 = vld [vmem:[#allocation13 + $0x58] sm:$0xff] }
 0x231   :  { %1210 = vmatpush.msrb.mxu2 %v1121_v2  ;;  %1257 = vmatpush.msrb.mxu3 %v1227_v9  ;;  %v1301_v2 = vld [vmem:[#allocation16 + $0x8] sm:$0xff] }
 0x232   :  { %v904_v13 = vadd.f32 %v2013_v10, %v896_v11  ;;  %v1142_v11 = vld [vmem:[#allocation13 + $0x48] sm:$0xff] }
 0x233   :  { %1211 = vmatpush.msrb.mxu2 %v1120_v3  ;;  %1166 = vmatpush.msrb.mxu1 %v1142_v11  ;;  %v1300_v3 = vld [vmem:[#allocation16] sm:$0xff]  ;;  %v1322_v9 = vld [vmem:[#allocation16 + $0x48] sm:$0xff]  ;;  %v1406_v11 = vld [vmem:[#allocation16 + $0x50] sm:$0xff] }
 0x234   :  { %v912_v16 = vmul.f32 0.01, %v904_v13  ;;  %vm908_vm1 = vcmp.gt.f32.partialorder %v904_v13, 0.0  ;;  %1346 = vmatpush.msra.mxu0 %v1322_v9  ;;  %v1967_v9 = vld [vmem:[%s3079_s15 + $0x50] sm:$0xff] }
 0x235   :  { %v799_v17 = vpop.f32.mrf.mxu3 }
 0x236   :  { %v841_v18 = vadd.f32 %v840_v12, %v799_v17  ;;  %v916_v19 = vsel %vm908_vm1, %v904_v13, %v912_v16  ;;  %v1141_v12 = vld [vmem:[#allocation13 + $0x40] sm:$0xff]  ;;  %v1140_v13 = vld [vmem:[#allocation13 + $0x38] sm:$0xff]  ;;  %v1139_v16 = vld [vmem:[#allocation13 + $0x30] sm:$0xff] }
 0x237   :  { %1938 = vmatmul.msk.f32.vlgmr.msrb.gmra.mxu0 %vm532_vm7, %v916_v19  ;;  %v843_v22 = vpop.f32.mrf.mxu0  ;;  %v920_v42 = vrot.slane %v916_v19, 4  ;;  %v937_v43 = vrot.slane %v916_v19, 6  ;;  %1167 = vmatpush.msrb.mxu1 %v1141_v12  ;;  %v1138_v17 = vld [vmem:[#allocation13 + $0x28] sm:$0xff]  ;;  %v1321_v12 = vld [vmem:[#allocation16 + $0x40] sm:$0xff] }
 0x238   :  { %v897_v20 = vadd.f32 %v887_v14, %v841_v18  ;;  %1347 = vmatpush.msra.mxu0 %v1321_v12  ;;  %v1719_v12 = vld [vmem:[%s3083_s19 + $0x20] sm:$0xff] }
 0x239   :  { %1168 = vmatpush.msrb.mxu1 %v1140_v13  ;;  %v1320_v13 = vld [vmem:[#allocation16 + $0x38] sm:$0xff] }
 0x23a   :  { %v905_v21 = vadd.f32 %v2013_v10, %v897_v20  ;;  %1348 = vmatpush.msra.mxu0 %v1320_v13 }
 0x23b   :  { %1169 = vmatpush.msrb.mxu1 %v1139_v16 }
 0x23c   :  { %vm909_vm3 = vcmp.gt.f32.partialorder %v905_v21, 0.0  ;;  %v913_v23 = vmul.f32 0.01, %v905_v21 }
 0x23d   :  { %v802_v26 = vpop.f32.mrf.mxu3  ;;  %1170 = vmatpush.msrb.mxu1 %v1138_v17  ;;  %v1319_v17 = vld [vmem:[#allocation16 + $0x30] sm:$0xff] }
 0x23e   :  { %v844_v27 = vadd.f32 %v843_v22, %v802_v26  ;;  %v917_v28 = vsel %vm909_vm3, %v905_v21, %v913_v23  ;;  %v2014_v21 = vld [vmem:[#allocation11] ss:$0 sm:$0xff]  ;;  %1349 = vmatpush.msra.mxu0 %v1319_v17 }
 0x23f   :  { %1939 = vmatmul.msk.f32.gmra.mxu0 %vm532_vm7, %v917_v28  ;;  %v846_v33 = vpop.f32.mrf.mxu0  ;;  %v921_v50 = vrot.slane %v917_v28, 4  ;;  %v938_v51 = vrot.slane %v917_v28, 6  ;;  %1387 = vmatpush.msra.mxu1 %v1304_v62  ;;  %v1971_v62 = vld [vmem:[%s3079_s15 + $0x70] sm:$0xff] }
 0x240   :  { %v898_v29 = vadd.f32 %v890_v24, %v844_v27 }
 0x241   :  { %v943_v52 = vsel %vm304_vm2, %v937_v43, %v938_v51  ;;  %v926_v53 = vsel %vm731_vm15, %v920_v42, %v921_v50  ;;  %1388 = vmatpush.msra.mxu1 %v1303_v63  ;;  %v1966_v63 = vld [vmem:[%s3079_s15 + $0x48] sm:$0xff] }
 0x242   :  { %v906_v30 = vadd.f32 %v2013_v10, %v898_v29 }
 0x243   :  { %1389 = vmatpush.msra.mxu1 %v1302_v0  ;;  %v1970_v0 = vld [vmem:[%s3079_s15 + $0x68] sm:$0xff] }
 0x244   :  { %vm910_vm4 = vcmp.gt.f32.partialorder %v906_v30, 0.0  ;;  %v914_v31 = vmul.f32 0.01, %v906_v30 }
 0x245   :  { %v805_v34 = vpop.f32.mrf.mxu3  ;;  %1390 = vmatpush.msra.mxu1 %v1301_v2  ;;  %v1965_v2 = vld [vmem:[%s3079_s15 + $0x40] sm:$0xff] }
 0x246   :  { %v847_v35 = vadd.f32 %v846_v33, %v805_v34  ;;  %v918_v36 = vsel %vm910_vm4, %v906_v30, %v914_v31  ;;  %vm1612_vm4 = vcmask 261120  }
 0x247   :  { %1940 = vmatmul.msk.f32.gmra.mxu0 %vm532_vm7, %v918_v36  ;;  %v922_v54 = vrot.slane %v918_v36, 4  ;;  %v939_v55 = vrot.slane %v918_v36, 6  ;;  %1391 = vmatpush.msra.mxu1 %v1300_v3  ;;  %v1964_v3 = vld [vmem:[%s3079_s15 + $0x38] sm:$0xff] }
 0x248   :  { %v899_v38 = vadd.f32 %v893_v37, %v847_v35 }
 0x249   :  { %v942_v56 = vsel %vm304_vm2, %v938_v51, %v939_v55  ;;  %v925_v57 = vsel %vm731_vm15, %v921_v50, %v922_v54 }
 0x24a   :  { %v907_v39 = vadd.f32 %v2013_v10, %v899_v38  ;;  %v947_v58 = vsel %vm294_vm5, %v942_v56, 0.0  ;;  %v930_v59 = vsel %vm296_vm0, %v925_v57, 0.0  ;;  %v1226_v10 = vld [vmem:[#allocation13 + $0x50] sm:$0xff] }
 0x24b   :  { %1258 = vmatpush.msrb.mxu3 %v1226_v10  ;;  %v1407_v10 = vld [vmem:[#allocation16 + $0x58] sm:$0xff] }
 0x24c   :  { %vm911_vm6 = vcmp.gt.f32.partialorder %v907_v39, 0.0  ;;  %v915_v40 = vmul.f32 0.01, %v907_v39 }
 0x24e   :  { %v919_v41 = vsel %vm911_vm6, %v907_v39, %v915_v40 }
 0x24f   :  { %v923_v44 = vrot.slane %v919_v41, 4  ;;  %v940_v45 = vrot.slane %v919_v41, 6  ;;  %1941 = vmatmul.msk.f32.gmra.mxu0 %vm532_vm7, %v919_v41 }
 0x251   :  { %v944_v46 = vsel %vm304_vm2, %v940_v45, %v937_v43  ;;  %v927_v47 = vsel %vm731_vm15, %v923_v44, %v920_v42  ;;  %v941_v60 = vsel %vm304_vm2, %v939_v55, %v940_v45  ;;  %v924_v61 = vsel %vm731_vm15, %v922_v54, %v923_v44 }
 0x252   :  { %v945_v48 = vsel %vm294_vm5, %v944_v46, 0.0  ;;  %v928_v49 = vsel %vm296_vm0, %v927_v47, 0.0 }
 0x253   :  { %1930 = vmatmul.msk.f32.vlgmr.msra.gmra.mxu2 %vm532_vm7, %v945_v48  ;;  %1934 = vmatmul.msk.f32.vlgmr.msra.gmra.mxu3 %vm532_vm7, %v928_v49 }
 0x254   :  { %1434 = vmatpush.msra.mxu2 %v1410_v5  ;;  %1519 = vmatpush.msra.mxu3 %v1971_v62  ;;  %v1963_v5 = vld [vmem:[%s3079_s15 + $0x30] sm:$0xff] }
 0x256   :  { %1435 = vmatpush.msra.mxu2 %v1409_v7  ;;  %1520 = vmatpush.msra.mxu3 %v1970_v0  ;;  %v1962_v7 = vld [vmem:[%s3079_s15 + $0x28] sm:$0xff] }
 0x258   :  { %1436 = vmatpush.msra.mxu2 %v1408_v8  ;;  %1521 = vmatpush.msra.mxu3 %v1969_v1  ;;  %v1968_v8 = vld [vmem:[%s3079_s15 + $0x58] sm:$0xff] }
 0x25a   :  { %1437 = vmatpush.msra.mxu2 %v1407_v10  ;;  %1522 = vmatpush.msra.mxu3 %v1968_v8 }
 0x25b   :  { %1931 = vmatmul.msk.f32.gmra.mxu2 %vm532_vm7, %v943_v52  ;;  %1935 = vmatmul.msk.f32.gmra.mxu3 %vm532_vm7, %v926_v53 }
 0x25c   :  { %1438 = vmatpush.msra.mxu2 %v1406_v11  ;;  %1523 = vmatpush.msra.mxu3 %v1967_v9 }
 0x263   :  { %1932 = vmatmul.msk.f32.gmra.mxu2 %vm532_vm7, %v947_v58  ;;  %1936 = vmatmul.msk.f32.gmra.mxu3 %vm532_vm7, %v930_v59 }
 0x26b   :  { %1933 = vmatmul.msk.f32.gmra.mxu2 %vm532_vm7, %v941_v60  ;;  %1937 = vmatmul.msk.f32.gmra.mxu3 %vm532_vm7, %v924_v61 }
 0x273   :  { %1212 = vmatmul.f32.vlgmr.msrb.gmra.mxu2 %v2418_v6 }
 0x2b4   :  { %v1072_v14 = vpop.f32.mrf.mxu0 }
 0x2bc   :  { %v1075_v23 = vpop.f32.mrf.mxu0 }
 0x2c4   :  { %v1078_v35 = vpop.f32.mrf.mxu0 }
 0x2cc   :  { %v1081_v48 = vpop.f32.mrf.mxu0 }
 0x2d6   :  { %v984_v18 = vpop.f32.mrf.mxu2  ;;  %v1025_v19 = vpop.f32.mrf.mxu3 }
 0x2d7   :  { %v1026_v20 = vadd.f32 %v1025_v19, %v984_v18  ;;  %v1318_v18 = vld [vmem:[#allocation16 + $0x28] sm:$0xff] }
 0x2d8   :  { %1350 = vmatpush.msra.mxu0 %v1318_v18 }
 0x2d9   :  { %v1084_v22 = vadd.f32 %v1072_v14, %v1026_v20 }
 0x2da   :  { %1560 = vmatpush.msrb.mxu0 %v1966_v63 }
 0x2db   :  { %v1092_v24 = vadd.f32 %v2014_v21, %v1084_v22 }
 0x2dc   :  { %1561 = vmatpush.msrb.mxu0 %v1965_v2 }
 0x2dd   :  { %vm1096_vm2 = vcmp.gt.f32.partialorder %v1092_v24, 0.0  ;;  %v1100_v26 = vmul.f32 0.01, %v1092_v24 }
 0x2de   :  { %v987_v27 = vpop.f32.mrf.mxu2  ;;  %v1028_v28 = vpop.f32.mrf.mxu3  ;;  %1562 = vmatpush.msrb.mxu0 %v1964_v3 }
 0x2df   :  { %v1029_v29 = vadd.f32 %v1028_v28, %v987_v27  ;;  %v1104_v30 = vsel %vm1096_vm2, %v1092_v24, %v1100_v26 }
 0x2e0   :  { %v2906_v31 = vadd.f32 %v1104_v30, %v2810_v4  ;;  %1563 = vmatpush.msrb.mxu0 %v1963_v5 }
 0x2e1   :  { %v1085_v33 = vadd.f32 %v1075_v23, %v1029_v29 }
 0x2e2   :  { %1946 = vmatmul.msk.f32.gmra.mxu2 %vm532_vm7, %v2906_v31  ;;  %1948 = vmatmul.msk.f32.vlgmr.msrb.gmra.mxu3 %vm532_vm7, %v2906_v31 }
 0x2e3   :  { %v1093_v34 = vadd.f32 %v2014_v21, %v1085_v33  ;;  %1564 = vmatpush.msrb.mxu0 %v1962_v7  ;;  %1735 = vmatpush.msrb.mxu3 %v1719_v12 }
 0x2e5   :  { %v1101_v36 = vmul.f32 0.01, %v1093_v34  ;;  %vm1097_vm5 = vcmp.gt.f32.partialorder %v1093_v34, 0.0 }
 0x2e6   :  { %v990_v37 = vpop.f32.mrf.mxu2  ;;  %v1031_v38 = vpop.f32.mrf.mxu3 }
 0x2e7   :  { %v1032_v39 = vadd.f32 %v1031_v38, %v990_v37  ;;  %v1105_v40 = vsel %vm1097_vm5, %v1093_v34, %v1101_v36 }
 0x2e8   :  { %v2913_v41 = vadd.f32 %v1105_v40, %v2814_v15 }
 0x2e9   :  { %v1086_v4 = vadd.f32 %v1078_v35, %v1032_v39 }
 0x2ea   :  { %1218 = vmatmul.f32.gmra.mxu2 %v2418_v6  ;;  %1949 = vmatmul.msk.f32.gmra.mxu3 %vm532_vm7, %v2913_v41  ;;  %v1126_v57 = vrot.slane %v2913_v41, 4 }
 0x2eb   :  { %v1094_v42 = vadd.f32 %v2014_v21, %v1086_v4 }
 0x2ed   :  { %vm1098_vm8 = vcmp.gt.f32.partialorder %v1094_v42, 0.0  ;;  %v1102_v43 = vmul.f32 0.01, %v1094_v42 }
 0x2ee   :  { %v993_v44 = vpop.f32.mrf.mxu2  ;;  %v1034_v45 = vpop.f32.mrf.mxu3 }
 0x2ef   :  { %v1035_v46 = vadd.f32 %v1034_v45, %v993_v44  ;;  %v1106_v47 = vsel %vm1098_vm8, %v1094_v42, %v1102_v43 }
 0x2f0   :  { %v2919_v49 = vadd.f32 %v1106_v47, %v2818_v25  ;;  %v1125_v25 = vrot.slane %v2906_v31, 4 }
 0x2f1   :  { %v1087_v50 = vadd.f32 %v1081_v48, %v1035_v46 }
 0x2f2   :  { %1947 = vmatmul.msk.f32.gmra.mxu2 %vm532_vm7, %v2919_v49  ;;  %1950 = vmatmul.msk.f32.gmra.mxu3 %vm532_vm7, %v2919_v49  ;;  %v1127_v58 = vrot.slane %v2919_v49, 4 }
 0x2f3   :  { %v1095_v15 = vadd.f32 %v2014_v21, %v1087_v50  ;;  %v2015_v21 = vld [vmem:[#allocation14] ss:$0 sm:$0xff] }
 0x2f4   :  { %v1130_v59 = vsel %vm731_vm15, %v1126_v57, %v1127_v58 }
 0x2f5   :  { %v1103_v51 = vmul.f32 0.01, %v1095_v15  ;;  %vm1099_vm9 = vcmp.gt.f32.partialorder %v1095_v15, 0.0  ;;  %v1135_v60 = vsel %vm296_vm0, %v1130_v59, 0.0 }
 0x2f6   :  { %v1213_v14 = vpop.f32.mrf.mxu2 }
 0x2f7   :  { %v1107_v52 = vsel %vm1099_vm9, %v1095_v15, %v1103_v51 }
 0x2f8   :  { %v2926_v53 = vadd.f32 %v1107_v52, %v2822_v32  ;;  %v1131_v32 = vsel %vm731_vm15, %v1125_v25, %v1126_v57 }
 0x2fa   :  { %v1128_v54 = vrot.slane %v2926_v53, 4  ;;  %1951 = vmatmul.msk.f32.gmra.mxu3 %vm532_vm7, %v2926_v53 }
 0x2fc   :  { %v1132_v55 = vsel %vm731_vm15, %v1128_v54, %v1125_v25  ;;  %v1129_v61 = vsel %vm731_vm15, %v1127_v58, %v1128_v54 }
 0x2fd   :  { %v1133_v56 = vsel %vm296_vm0, %v1132_v55, 0.0 }
 0x2fe   :  { %1942 = vmatmul.msk.f32.vlgmr.msrb.gmra.mxu1 %vm532_vm7, %v1133_v56 }
 0x306   :  { %1943 = vmatmul.msk.f32.gmra.mxu1 %vm532_vm7, %v1131_v32 }
 0x30e   :  { %1944 = vmatmul.msk.f32.gmra.mxu1 %vm532_vm7, %v1135_v60 }
 0x316   :  { %1945 = vmatmul.msk.f32.gmra.mxu1 %vm532_vm7, %v1129_v61 }
 0x31e   :  { %1392 = vmatmul.f32.vlgmr.msra.gmra.mxu1 %v2418_v6 }
 0x365   :  { %v1260_v16 = vpop.f32.mrf.mxu3  ;;  %v1216_v23 = vpop.f32.mrf.mxu2 }
 0x36d   :  { %v1263_v26 = vpop.f32.mrf.mxu3  ;;  %v1219_v35 = vpop.f32.mrf.mxu2 }
 0x375   :  { %v1266_v37 = vpop.f32.mrf.mxu3  ;;  %v1222_v44 = vpop.f32.mrf.mxu2 }
 0x37b   :  { %v1172_v19 = vpop.f32.mrf.mxu1 }
 0x37c   :  { %v1214_v20 = vadd.f32 %v1213_v14, %v1172_v19  ;;  %v1718_v19 = vld [vmem:[%s3083_s19 + $0x18] sm:$0xff] }
 0x37d   :  { %v1269_v48 = vpop.f32.mrf.mxu3  ;;  %1736 = vmatpush.msrb.mxu3 %v1718_v19 }
 0x37e   :  { %v1272_v22 = vadd.f32 %v1260_v16, %v1214_v20  ;;  %v2016_v16 = vld [vmem:[#allocation17] ss:$0 sm:$0xff]  ;;  %v1717_v20 = vld [vmem:[%s3083_s19 + $0x10] sm:$0xff] }
 0x37f   :  { %1737 = vmatpush.msrb.mxu3 %v1717_v20 }
 0x380   :  { %v1280_v24 = vadd.f32 %v2015_v21, %v1272_v22 }
 0x382   :  { %vm1284_vm10 = vcmp.gt.f32.partialorder %v1280_v24, 0.0  ;;  %v1288_v27 = vmul.f32 0.01, %v1280_v24 }
 0x383   :  { %v1175_v28 = vpop.f32.mrf.mxu1 }
 0x384   :  { %v1217_v29 = vadd.f32 %v1216_v23, %v1175_v28  ;;  %v1292_v30 = vsel %vm1284_vm10, %v1280_v24, %v1288_v27  ;;  %v1716_v23 = vld [vmem:[%s3083_s19 + $0x8] sm:$0xff]  ;;  %v1715_v27 = vld [vmem:[%s3083_s19] sm:$0xff] }
 0x385   :  { %1956 = vmatmul.msk.f32.gmra.mxu1 %vm532_vm7, %v1292_v30  ;;  %1958 = vmatmul.msk.f32.vlgmr.msra.gmra.mxu2 %vm532_vm7, %v1292_v30  ;;  %v1305_v54 = vrot.slane %v1292_v30, 4 }
 0x386   :  { %v1273_v33 = vadd.f32 %v1263_v26, %v1217_v29  ;;  %1738 = vmatpush.msrb.mxu3 %v1716_v23  ;;  %v1778_v23 = vld [vmem:[#allocation22 + $0x18] sm:$0xff] }
 0x388   :  { %v1281_v34 = vadd.f32 %v2015_v21, %v1273_v33  ;;  %1739 = vmatpush.msrb.mxu3 %v1715_v27 }
 0x38a   :  { %vm1285_vm11 = vcmp.gt.f32.partialorder %v1281_v34, 0.0  ;;  %v1289_v36 = vmul.f32 0.01, %v1281_v34 }
 0x38b   :  { %v1178_v38 = vpop.f32.mrf.mxu1 }
 0x38c   :  { %v1220_v39 = vadd.f32 %v1219_v35, %v1178_v38  ;;  %v1293_v40 = vsel %vm1285_vm11, %v1281_v34, %v1289_v36  ;;  %vm1785_vm11 = vcmask 1041409  }
 0x38d   :  { %1398 = vmatmul.f32.gmra.mxu1 %v2418_v6  ;;  %1959 = vmatmul.msk.f32.gmra.mxu2 %vm532_vm7, %v1293_v40  ;;  %v1306_v57 = vrot.slane %v1293_v40, 4 }
 0x38e   :  { %v1274_v4 = vadd.f32 %v1266_v37, %v1220_v39 }
 0x38f   :  { %v1311_v32 = vsel %vm731_vm15, %v1305_v54, %v1306_v57 }
 0x390   :  { %v1282_v42 = vadd.f32 %v2015_v21, %v1274_v4 }
 0x392   :  { %vm1286_vm12 = vcmp.gt.f32.partialorder %v1282_v42, 0.0  ;;  %v1290_v43 = vmul.f32 0.01, %v1282_v42 }
 0x393   :  { %v1181_v45 = vpop.f32.mrf.mxu1 }
 0x394   :  { %v1223_v46 = vadd.f32 %v1222_v44, %v1181_v45  ;;  %v1294_v47 = vsel %vm1286_vm12, %v1282_v42, %v1290_v43 }
 0x395   :  { %1957 = vmatmul.msk.f32.gmra.mxu1 %vm532_vm7, %v1294_v47  ;;  %1960 = vmatmul.msk.f32.gmra.mxu2 %vm532_vm7, %v1294_v47  ;;  %v1307_v58 = vrot.slane %v1294_v47, 4 }
 0x396   :  { %v1275_v50 = vadd.f32 %v1269_v48, %v1223_v46 }
 0x397   :  { %v1310_v59 = vsel %vm731_vm15, %v1306_v57, %v1307_v58  ;;  %v1610_v57 = vld [vmem:[#allocation19 + $0x50] sm:$0xff] }
 0x398   :  { %v1283_v15 = vadd.f32 %v2015_v21, %v1275_v50  ;;  %v1315_v60 = vsel %vm296_vm0, %v1310_v59, 0.0 }
 0x39a   :  { %vm1287_vm13 = vcmp.gt.f32.partialorder %v1283_v15, 0.0  ;;  %v1291_v51 = vmul.f32 0.01, %v1283_v15 }
 0x39b   :  { %v1393_v10 = vpop.f32.mrf.mxu1 }
 0x39c   :  { %v1295_v52 = vsel %vm1287_vm13, %v1283_v15, %v1291_v51 }
 0x39d   :  { %v1308_v25 = vrot.slane %v1295_v52, 4  ;;  %1961 = vmatmul.msk.f32.gmra.mxu2 %vm532_vm7, %v1295_v52 }
 0x39f   :  { %v1312_v55 = vsel %vm731_vm15, %v1308_v25, %v1305_v54  ;;  %v1309_v61 = vsel %vm731_vm15, %v1307_v58, %v1308_v25  ;;  %v1606_v25 = vld [vmem:[#allocation19 + $0x38] sm:$0xff]  ;;  %v1608_v58 = vld [vmem:[#allocation19 + $0x40] sm:$0xff] }
 0x3a0   :  { %v1313_v56 = vsel %vm296_vm0, %v1312_v55, 0.0  ;;  %v1611_v55 = vld [vmem:[#allocation19 + $0x58] sm:$0xff]  ;;  %1678 = vmatpush.msrb.mxu2 %v1606_v25 }
 0x3a1   :  { %1952 = vmatmul.msk.f32.vlgmr.msra.gmra.mxu0 %vm532_vm7, %v1313_v56  ;;  %v1605_v56 = vld [vmem:[#allocation19 + $0x30] sm:$0xff]  ;;  %1637 = vmatpush.msrb.mxu1 %v1611_v55 }
 0x3a2   :  { %1679 = vmatpush.msrb.mxu2 %v1605_v56  ;;  %1801 = vmatpush.msra.mxu0 %v1778_v23  ;;  %v1811_v55 = vld [vmem:[#allocation23 + $0x8] sm:$0xff] }
 0x3a3   :  { %1638 = vmatpush.msrb.mxu1 %v1610_v57  ;;  %v1810_v57 = vld [vmem:[#allocation23] sm:$0xff] }
 0x3a9   :  { %1953 = vmatmul.msk.f32.gmra.mxu0 %vm532_vm7, %v1311_v32  ;;  %v1609_v32 = vld [vmem:[#allocation19 + $0x48] sm:$0xff] }
 0x3aa   :  { %1639 = vmatpush.msrb.mxu1 %v1609_v32 }
 0x3ac   :  { %1640 = vmatpush.msrb.mxu1 %v1608_v58 }
 0x3b1   :  { %1954 = vmatmul.msk.f32.gmra.mxu0 %vm532_vm7, %v1315_v60  ;;  %v2017_v60 = vld [vmem:[%s3080_s16] ss:$0 sm:$0xff] }
 0x3b9   :  { %1955 = vmatmul.msk.f32.gmra.mxu0 %vm532_vm7, %v1309_v61 }
 0x3c1   :  { %1565 = vmatmul.f32.vlgmr.msrb.gmra.mxu0 %v2418_v6 }
 0x402   :  { %v1396_v18 = vpop.f32.mrf.mxu1 }
 0x408   :  { %v1440_v11 = vpop.f32.mrf.mxu2 }
 0x40a   :  { %v1399_v35 = vpop.f32.mrf.mxu1 }
 0x410   :  { %v1443_v22 = vpop.f32.mrf.mxu2 }
 0x412   :  { %v1402_v44 = vpop.f32.mrf.mxu1 }
 0x418   :  { %v1446_v37 = vpop.f32.mrf.mxu2 }
 0x41e   :  { %v1352_v13 = vpop.f32.mrf.mxu0 }
 0x41f   :  { %v1394_v14 = vadd.f32 %v1393_v10, %v1352_v13 }
 0x420   :  { %v1449_v48 = vpop.f32.mrf.mxu2 }
 0x421   :  { %v1452_v17 = vadd.f32 %v1440_v11, %v1394_v14 }
 0x423   :  { %v1460_v21 = vadd.f32 %v2016_v16, %v1452_v17 }
 0x425   :  { %vm1464_vm14 = vcmp.gt.f32.partialorder %v1460_v21, 0.0  ;;  %v1468_v24 = vmul.f32 0.01, %v1460_v21 }
 0x426   :  { %v1355_v26 = vpop.f32.mrf.mxu0 }
 0x427   :  { %v1472_v28 = vsel %vm1464_vm14, %v1460_v21, %v1468_v24  ;;  %v1397_v29 = vadd.f32 %v1396_v18, %v1355_v26 }
 0x428   :  { %v1476_v30 = vadd.f32 %v1472_v28, %v2906_v31  ;;  %v2019_v28 = vld [vmem:[#allocation20] ss:$0 sm:$0xff] }
 0x429   :  { %v1453_v33 = vadd.f32 %v1443_v22, %v1397_v29 }
 0x42a   :  { %1972 = vmatmul.msk.f32.vlgmr.msra.gmra.mxu3 %vm532_vm7, %v1476_v30  ;;  %1976 = vmatmul.msk.f32.gmra.mxu0 %vm532_vm7, %v1476_v30 }
 0x42b   :  { %v1461_v34 = vadd.f32 %v2016_v16, %v1453_v33 }
 0x42d   :  { %v1469_v36 = vmul.f32 0.01, %v1461_v34  ;;  %vm1465_vm15 = vcmp.gt.f32.partialorder %v1461_v34, 0.0 }
 0x42e   :  { %v1358_v38 = vpop.f32.mrf.mxu0 }
 0x42f   :  { %v1400_v39 = vadd.f32 %v1399_v35, %v1358_v38  ;;  %v1473_v40 = vsel %vm1465_vm15, %v1461_v34, %v1469_v36  ;;  %v1777_v36 = vld [vmem:[#allocation22 + $0x10] sm:$0xff] }
 0x430   :  { %v1477_v4 = vadd.f32 %v1473_v40, %v2913_v41  ;;  %1802 = vmatpush.msra.mxu0 %v1777_v36  ;;  %v1775_v40 = vld [vmem:[#allocation22] sm:$0xff] }
 0x431   :  { %v1454_v42 = vadd.f32 %v1446_v37, %v1400_v39  ;;  %v1776_v37 = vld [vmem:[#allocation22 + $0x8] sm:$0xff] }
 0x432   :  { %1973 = vmatmul.msk.f32.gmra.mxu3 %vm532_vm7, %v1477_v4  ;;  %1571 = vmatmul.f32.gmra.mxu0 %v2418_v6 }
 0x433   :  { %v1462_v31 = vadd.f32 %v2016_v16, %v1454_v42  ;;  %1803 = vmatpush.msra.mxu0 %v1776_v37 }
 0x435   :  { %v1470_v43 = vmul.f32 0.01, %v1462_v31  ;;  %vm1466_vm0 = vcmp.gt.f32.partialorder %v1462_v31, 0.0  ;;  %1804 = vmatpush.msra.mxu0 %v1775_v40 }
 0x436   :  { %v1361_v45 = vpop.f32.mrf.mxu0 }
 0x437   :  { %v1403_v46 = vadd.f32 %v1402_v44, %v1361_v45  ;;  %v1474_v47 = vsel %vm1466_vm0, %v1462_v31, %v1470_v43 }
 0x438   :  { %v1478_v50 = vadd.f32 %v1474_v47, %v2919_v49  ;;  %v1604_v49 = vld [vmem:[#allocation19 + $0x28] sm:$0xff] }
 0x439   :  { %v1455_v15 = vadd.f32 %v1449_v48, %v1403_v46  ;;  %1680 = vmatpush.msrb.mxu2 %v1604_v49 }
 0x43a   :  { %1974 = vmatmul.msk.f32.gmra.mxu3 %vm532_vm7, %v1478_v50  ;;  %1977 = vmatmul.msk.f32.gmra.mxu0 %vm532_vm7, %v1478_v50 }
 0x43b   :  { %v1463_v41 = vadd.f32 %v2016_v16, %v1455_v15 }
 0x43d   :  { %v1471_v51 = vmul.f32 0.01, %v1463_v41  ;;  %vm1467_vm1 = vcmp.gt.f32.partialorder %v1463_v41, 0.0 }
 0x43e   :  { %v1566_v59 = vpop.f32.mrf.mxu0 }
 0x43f   :  { %v1475_v52 = vsel %vm1467_vm1, %v1463_v41, %v1471_v51  ;;  %v1813_v51 = vld [vmem:[#allocation23 + $0x18] sm:$0xff] }
 0x440   :  { %v1479_v54 = vadd.f32 %v1475_v52, %v2926_v53  ;;  %v1603_v53 = vld [vmem:[#allocation19 + $0x20] sm:$0xff]  ;;  %v1812_v52 = vld [vmem:[#allocation23 + $0x10] sm:$0xff]  ;;  %1833 = vmatpush.msra.mxu1 %v1813_v51 }
 0x441   :  { %1681 = vmatpush.msrb.mxu2 %v1603_v53 }
 0x442   :  { %1975 = vmatmul.msk.f32.gmra.mxu3 %vm532_vm7, %v1479_v54  ;;  %1682 = vmatmul.f32.vlgmr.msrb.gmra.mxu2 %v2418_v6 }
 0x443   :  { %1834 = vmatpush.msra.mxu1 %v1812_v52 }
 0x445   :  { %1835 = vmatpush.msra.mxu1 %v1811_v55 }
 0x447   :  { %1836 = vmatpush.msra.mxu1 %v1810_v57 }
 0x44a   :  { %1984 = vmatmul.msk.f32.vlgmr.msrb.gmra.mxu3 %vm532_vm7, %v1476_v30 }
 0x452   :  { %1985 = vmatmul.msk.f32.gmra.mxu3 %vm532_vm7, %v1477_v4  ;;  %v2018_v4 = vld [vmem:[%s3084_s20] ss:$0 sm:$0xff] }
 0x45a   :  { %1986 = vmatmul.msk.f32.gmra.mxu3 %vm532_vm7, %v1478_v50 }
 0x462   :  { %1987 = vmatmul.msk.f32.gmra.mxu3 %vm532_vm7, %v1479_v54 }
 0x4a7   :  { %v1569_v0 = vpop.f32.mrf.mxu0 }
 0x4ad   :  { %v1525_v61 = vpop.f32.mrf.mxu3 }
 0x4ae   :  { %v1567_v62 = vadd.f32 %v1566_v59, %v1525_v61 }
 0x4af   :  { %v1572_v9 = vpop.f32.mrf.mxu0 }
 0x4b0   :  { %v1582_v63 = vadd.f32 %v2017_v60, %v1567_v62 }
 0x4b2   :  { %vm1586_vm3 = vcmp.gt.f32.partialorder %v1582_v63, 0.0  ;;  %v1590_v1 = vmul.f32 0.01, %v1582_v63 }
 0x4b4   :  { %v1594_v2 = vsel %vm1586_vm3, %v1582_v63, %v1590_v1 }
 0x4b5   :  { %v1528_v3 = vpop.f32.mrf.mxu3  ;;  %1978 = vmatmul.msk.f32.vlgmr.msrb.gmra.mxu1 %vm1612_vm4, %v1594_v2  ;;  %1982 = vmatmul.msk.f32.gmra.mxu2 %vm1612_vm4, %v1594_v2 }
 0x4b6   :  { %v1570_v5 = vadd.f32 %v1569_v0, %v1528_v3 }
 0x4b7   :  { %v1575_v17 = vpop.f32.mrf.mxu0 }
 0x4b8   :  { %v1583_v7 = vadd.f32 %v2017_v60, %v1570_v5 }
 0x4ba   :  { %vm1587_vm7 = vcmp.gt.f32.partialorder %v1583_v7, 0.0  ;;  %v1591_v8 = vmul.f32 0.01, %v1583_v7 }
 0x4bc   :  { %v1595_v10 = vsel %vm1587_vm7, %v1583_v7, %v1591_v8 }
 0x4bd   :  { %v1531_v11 = vpop.f32.mrf.mxu3  ;;  %1979 = vmatmul.msk.f32.gmra.mxu1 %vm1612_vm4, %v1595_v10  ;;  %1688 = vmatmul.f32.gmra.mxu2 %v2418_v6 }
 0x4be   :  { %v1573_v12 = vadd.f32 %v1572_v9, %v1531_v11 }
 0x4c0   :  { %v1584_v13 = vadd.f32 %v2017_v60, %v1573_v12 }
 0x4c2   :  { %vm1588_vm6 = vcmp.gt.f32.partialorder %v1584_v13, 0.0  ;;  %v1592_v14 = vmul.f32 0.01, %v1584_v13 }
 0x4c4   :  { %v1596_v16 = vsel %vm1588_vm6, %v1584_v13, %v1592_v14 }
 0x4c5   :  { %v1534_v18 = vpop.f32.mrf.mxu3  ;;  %1980 = vmatmul.msk.f32.gmra.mxu1 %vm1612_vm4, %v1596_v16  ;;  %1983 = vmatmul.msk.f32.gmra.mxu2 %vm1612_vm4, %v1596_v16  ;;  %v1683_v6 = vpop.f32.mrf.mxu2 }
 0x4c6   :  { %v1576_v19 = vadd.f32 %v1575_v17, %v1534_v18 }
 0x4c8   :  { %v1585_v20 = vadd.f32 %v2017_v60, %v1576_v19 }
 0x4ca   :  { %vm1589_vm2 = vcmp.gt.f32.partialorder %v1585_v20, 0.0  ;;  %v1593_v21 = vmul.f32 0.01, %v1585_v20 }
 0x4cc   :  { %v1597_v22 = vsel %vm1589_vm2, %v1585_v20, %v1593_v21 }
 0x4cd   :  { %1981 = vmatmul.msk.f32.gmra.mxu1 %vm1612_vm4, %v1597_v22  ;;  %v1741_v24 = vpop.f32.mrf.mxu3 }
 0x4ce   :  { %v1742_v46 = vadd.f32 %v2018_v4, %v1741_v24 }
 0x4d5   :  { %v1744_v30 = vpop.f32.mrf.mxu3 }
 0x4d6   :  { %v1745_v31 = vadd.f32 %v2018_v4, %v1744_v30 }
 0x4dd   :  { %v1747_v50 = vpop.f32.mrf.mxu3 }
 0x4de   :  { %v1748_v0 = vadd.f32 %v2018_v4, %v1747_v50 }
 0x4e5   :  { %v1750_v60 = vpop.f32.mrf.mxu3 }
 0x4e6   :  { %v1751_v2 = vadd.f32 %v2018_v4, %v1750_v60 }
 0x532   :  { %v1642_v26 = vpop.f32.mrf.mxu1 }
 0x533   :  { %v1684_v27 = vadd.f32 %v1683_v6, %v1642_v26  ;;  %v2020_v6 = vld [vmem:[%s3086_s22] ss:$0 sm:$0xff] }
 0x535   :  { %v1699_v33 = vadd.f32 %v2019_v28, %v1684_v27 }
 0x537   :  { %v1707_v38 = vmul.f32 0.01, %v1699_v33  ;;  %vm1703_vm5 = vcmp.gt.f32.partialorder %v1699_v33, 0.0 }
 0x538   :  { %v1686_v29 = vpop.f32.mrf.mxu2 }
 0x539   :  { %v1711_v44 = vsel %vm1703_vm5, %v1699_v33, %v1707_v38 }
 0x53a   :  { %v1645_v34 = vpop.f32.mrf.mxu1  ;;  %v1753_v41 = vadd.f32 %v1742_v46, %v1711_v44 }
 0x53b   :  { %v1687_v35 = vadd.f32 %v1686_v29, %v1645_v34 }
 0x53c   :  { %v1757_v56 = vsel %vm1612_vm4, %v1753_v41, -inf }
 0x53d   :  { %v1700_v39 = vadd.f32 %v2019_v28, %v1687_v35 }
 0x53f   :  { %vm1704_vm8 = vcmp.gt.f32.partialorder %v1700_v39, 0.0  ;;  %v1708_v42 = vmul.f32 0.01, %v1700_v39 }
 0x540   :  { %v1689_v43 = vpop.f32.mrf.mxu2 }
 0x541   :  { %v1712_v45 = vsel %vm1704_vm8, %v1700_v39, %v1708_v42 }
 0x542   :  { %v1754_v47 = vadd.f32 %v1745_v31, %v1712_v45  ;;  %v1648_v48 = vpop.f32.mrf.mxu1 }
 0x543   :  { %v1690_v15 = vadd.f32 %v1689_v43, %v1648_v48 }
 0x544   :  { %v1758_v25 = vsel %vm1612_vm4, %v1754_v47, -inf }
 0x545   :  { %v1701_v54 = vadd.f32 %v2019_v28, %v1690_v15  ;;  %v1759_v49 = vmax.f32 %v1757_v56, %v1758_v25 }
 0x547   :  { %v1709_v32 = vmul.f32 0.01, %v1701_v54  ;;  %vm1705_vm9 = vcmp.gt.f32.partialorder %v1701_v54, 0.0  ;;  %v1760_v61 = vrot.slane %v1759_v49, 4 }
 0x548   :  { %v1692_v53 = vpop.f32.mrf.mxu2 }
 0x549   :  { %v1713_v62 = vsel %vm1705_vm9, %v1701_v54, %v1709_v32  ;;  %v1761_v5 = vmax.f32 %v1759_v49, %v1760_v61 }
 0x54a   :  { %v1651_v58 = vpop.f32.mrf.mxu1  ;;  %v1755_v3 = vadd.f32 %v1748_v0, %v1713_v62 }
 0x54b   :  { %v1693_v59 = vadd.f32 %v1692_v53, %v1651_v58  ;;  %v1762_v11 = vrot.slane %v1761_v5, 2 }
 0x54c   :  { %v1766_v9 = vsel %vm1612_vm4, %v1755_v3, -inf }
 0x54d   :  { %v1702_v63 = vadd.f32 %v2019_v28, %v1693_v59  ;;  %v1763_v16 = vmax.f32 %v1761_v5, %v1762_v11  ;;  %v2021_v28 = vld [vmem:[%s3088_s24] ss:$0 sm:$0xff] }
 0x54f   :  { %vm1706_vm10 = vcmp.gt.f32.partialorder %v1702_v63, 0.0  ;;  %v1710_v1 = vmul.f32 0.01, %v1702_v63  ;;  %v1764_v18 = vrot.slane %v1763_v16, 1 }
 0x551   :  { %v1714_v7 = vsel %vm1706_vm10, %v1702_v63, %v1710_v1  ;;  %v1765_v21 = vmax.f32 %v1763_v16, %v1764_v18 }
 0x552   :  { %v1756_v8 = vadd.f32 %v1751_v2, %v1714_v7 }
 0x554   :  { %v1767_v10 = vsel %vm1612_vm4, %v1756_v8, -inf }
 0x555   :  { %v1768_v12 = vmax.f32 %v1766_v9, %v1767_v10 }
 0x557   :  { %v1769_v13 = vrot.slane %v1768_v12, 4 }
 0x559   :  { %v1770_v14 = vmax.f32 %v1768_v12, %v1769_v13 }
 0x55b   :  { %v1771_v17 = vrot.slane %v1770_v14, 2 }
 0x55d   :  { %v1772_v19 = vmax.f32 %v1770_v14, %v1771_v17 }
 0x55f   :  { %v1773_v20 = vrot.slane %v1772_v19, 1 }
 0x561   :  { %v1774_v22 = vmax.f32 %v1772_v19, %v1773_v20 }
 0x563   :  { %v1786_v23 = vsel %vm1785_vm11, %v1774_v22, %v1765_v21 }
 0x564   :  { %1988 = vmatmul.msk.f32.vlgmr.msra.gmra.mxu0 %vm1612_vm4, %v1786_v23 }
 0x5e1   :  { %v1806_v24 = vpop.f32.mrf.mxu0 }
 0x5e2   :  { %v1807_v26 = vadd.f32 %v2020_v6, %v1806_v24 }
 0x5e4   :  { %v1809_v27 = vmax.f32 %v1807_v26, 0.0 }
 0x5e6   :  { %1989 = vmatmul.msk.f32.vlgmr.msra.gmra.mxu1 %vm1612_vm4, %v1809_v27 }
 0x663   :  { %v1838_v29 = vpop.f32.mrf.mxu1 }
 0x664   :  { %v1839_v30 = vadd.f32 %v2021_v28, %v1838_v29 }
 0x666   :  { %1841 = vst [vmem:[#allocation25] sm:$0x3] %v1839_v30 }
 0x667   :  { %1852 = dma.vmem_to_hbm [thread:$0]  %s1848_s27, 32, %s1850_s9, [#allocation4]  }
 0x668   :  { %2398 = dma.done.wait [#allocation4], 32  }
 0x669   :  { %2399 = vsyncadd [#allocation4], 4294967264 }
 0x66a   :  { %1857 = vsyncpa [#allocation3], 1 }
 0x66b   :  { %1858 = vsyncpa [#allocation6], 1 }
 0x66c   :  { %1859 = vsyncpa [#allocation9], 1 }
 0x66d   :  { %1860 = vsyncpa [#allocation12], 1 }
 0x66e   :  { %1861 = vsyncpa [#allocation15], 1 }
 0x66f   :  { %1862 = vsyncpa [#allocation18], 1 }
 0x670   :  { %1863 = vsyncpa [#allocation21], 1 }
 0x671   :  { %1864 = vsyncpa [#allocation24], 1 }
 0x672   :  { %1865 = vsyncpa [#allocation4], 1 }

</bundles_post_ra>
